<compile_context>
chip_gen: v7x
topology: tpu7x:2x2x1
jax: 0.10.0
libtpu: 0.0.40
codegen_flags: <defaults>
</compile_context>

<pallas_src>
import numpy as np
import jax
import jax.numpy as jnp
from jax.experimental import pallas as pl
from jax.experimental.pallas import tpu as pltpu

LANE = 128            # vreg lane width / padded channel count
AUG = 2 * LANE        # augmented prologue output width (features | logits)
COL_ADST = LANE       # column 128 of the prologue output: a_dst (target logit)
COL_ASRC = LANE + 1   # column 129 of the prologue output: a_src (source logit)
NUM_LAYERS = 3


def _round_up(x, m):
    return ((x + m - 1) // m) * m


# ----------------------------------------------------------------------------
# Fused kernel: 3x GATConv (+ReLU on the first two) + global_mean_pool
# ----------------------------------------------------------------------------
def _fused_gnn_kernel(x_hbm, adj_ref, w_ref, b_ref, pool_ref, o_ref,
                      h_ref, feat_ref, adst_ref, asrc_ref):
    l = pl.program_id(0)            # layer index 0..2
    i = pl.program_id(1)            # target-row tile index
    tm = adj_ref.shape[0]
    row0 = pl.multiple_of(i * tm, tm)

    # One-time init: DMA the node features (read exactly once, kept in HBM via
    # pl.ANY) into the resident bf16 h scratch and zero the pooled accumulator.
    @pl.when(jnp.logical_and(l == 0, i == 0))
    def _init():
        pltpu.sync_copy(x_hbm, h_ref)
        o_ref[...] = jnp.zeros_like(o_ref)

    # Per-layer prologue (first row tile): one bf16 MXU matmul (K=128, N=256)
    # gives haug[:, :128] = h @ W, haug[:,128] = a_dst, haug[:,129] = a_src.
    @pl.when(i == 0)
    def _layer_prologue():
        haug = jnp.dot(h_ref[...], w_ref[0],
                       preferred_element_type=jnp.float32)        # [n_pad, 256] f32
        feat_ref[...] = haug[:, :LANE].astype(jnp.bfloat16)        # bf16 slab, cast once
        adst_ref[...] = haug[:, COL_ADST:COL_ADST + 1]              # [n_pad, 1] f32
        # a_src must live along lanes.  Transpose the 128-wide logit slab: both
        # dims stay (8,128)-tile aligned (n_pad is a multiple of 128); a
        # narrower slice would hit the padded-minor transpose limitation.
        asrc_ref[...] = jnp.transpose(haug[:, LANE:AUG])[
            COL_ASRC - LANE:COL_ASRC - LANE + 1, :]                 # [1, n_pad] f32

    # ---- attention scores for this tile of target rows ----------------------
    a_dst = adst_ref[pl.ds(row0, tm), :]                            # [tm, 1]
    e = a_dst + asrc_ref[...]                                       # [tm, n_pad]
    e = jnp.where(e > 0, e, 0.2 * e)                                # LeakyReLU(0.2)
    e = jnp.where(adj_ref[...] != 0, e, jnp.float32(-1e30))         # mask non-edges
    e_max = jnp.max(e, axis=-1, keepdims=True)
    # Masked entries underflow to exactly 0 (self-loops keep e_max finite for
    # real rows), so no second masking pass is needed.
    p = jnp.exp(e - e_max)                                          # [tm, n_pad] f32
    denom = jnp.sum(p, axis=-1, keepdims=True)                      # XLU row-sum

    # ---- aggregation: bf16 MXU matmul, 128-wide output -----------------------
    agg = jnp.dot(p.astype(jnp.bfloat16), feat_ref[...],
                  preferred_element_type=jnp.float32)               # [tm, 128]
    feat = agg * pl.reciprocal(denom, approx=True) + b_ref[0]
    feat = jnp.where(l < NUM_LAYERS - 1, jnp.maximum(feat, 0.0), feat)  # ReLU

    # Next layer's input rows (bf16 resident scratch).
    h_ref[pl.ds(row0, tm), :] = feat.astype(jnp.bfloat16)

    # global_mean_pool folded into the last layer's epilogue.
    @pl.when(l == NUM_LAYERS - 1)
    def _pool():
        o_ref[...] += jnp.dot(pool_ref[...], feat,
                              preferred_element_type=jnp.float32)


# ----------------------------------------------------------------------------
# Wrapper: padding, augmented-weight construction, pallas_call glue
# ----------------------------------------------------------------------------
def _build_augmented_weight(w, att_src, att_dst):
    c_in, c_out = w.shape
    w = w.astype(jnp.float32)
    waug = jnp.zeros((LANE, AUG), jnp.float32)
    waug = waug.at[:c_in, :c_out].set(w)
    waug = waug.at[:c_in, COL_ADST].set(w @ att_dst.reshape(c_out))
    waug = waug.at[:c_in, COL_ASRC].set(w @ att_src.reshape(c_out))
    return waug.astype(jnp.bfloat16)


def gnn_encoder_forward(x, adj, pool_mat, params):
    """GAT -> ReLU -> GAT -> ReLU -> GAT -> global_mean_pool, one fused kernel."""
    assert len(params) == NUM_LAYERS
    n, c_in = x.shape
    g = pool_mat.shape[0]
    c_out_final = params[-1][0].shape[1]
    assert c_in <= LANE and all(p[0].shape[1] <= LANE for p in params)

    # Lane-dense padding of the node dimension (n_pad is the lane axis of
    # e/p/adj/asrc); tm=256 feeds the full 256-wide MXU on v6e/v7x.
    n_pad = _round_up(n, LANE)
    tm = n_pad if n_pad <= 512 else 256
    n_tiles = n_pad // tm
    g_pad = _round_up(g, 8)

    f32, bf16 = jnp.float32, jnp.bfloat16
    # Node features, bf16, no "ones" channel (denominator is a row-sum now).
    x_p = jnp.zeros((n_pad, LANE), bf16).at[:n, :c_in].set(x.astype(bf16))
    # Adjacency mask: int8 (only ever compared against 0); padded rows/cols = 0.
    adj_p = jnp.zeros((n_pad, n_pad), jnp.int8).at[:n, :n].set(adj.astype(jnp.int8))
    pool_p = jnp.zeros((g_pad, n_pad), f32).at[:g, :n].set(pool_mat.astype(f32))

    waug_stack = jnp.stack(
        [_build_augmented_weight(w, a_s, a_d) for (w, a_s, a_d, _) in params])
    bias_stack = jnp.stack(
        [jnp.zeros((1, LANE), f32).at[:, :b.shape[1]].set(b) for (_, _, _, b) in params])

    # VMEM budget: 3/4 of physical, capped at 96 MiB (keeps v7x's 64 MiB safe
    # while letting v5e/v6e use their larger scratchpad).
    try:
        phys_vmem = pltpu.get_tpu_info().vmem_capacity_bytes
    except Exception:
        phys_vmem = 64 * 1024 * 1024
    vmem_limit = min(int(phys_vmem * 3 // 4), 96 * 1024 * 1024)

    out = pl.pallas_call(
        _fused_gnn_kernel,
        out_shape=jax.ShapeDtypeStruct((g_pad, LANE), f32),
        grid_spec=pltpu.PrefetchScalarGridSpec(
            num_scalar_prefetch=0,
            grid=(NUM_LAYERS, n_tiles),
            in_specs=[
                pl.BlockSpec(memory_space=pl.ANY),                     # x (HBM, copied once)
                pl.BlockSpec((tm, n_pad), lambda l, i: (i, 0)),        # adj row tile (int8)
                pl.BlockSpec((1, LANE, AUG), lambda l, i: (l, 0, 0)),  # per-layer W_aug (bf16)
                pl.BlockSpec((1, 1, LANE), lambda l, i: (l, 0, 0)),    # per-layer bias (f32)
                pl.BlockSpec((g_pad, tm), lambda l, i: (0, i)),        # pool column tile
            ],
            out_specs=pl.BlockSpec((g_pad, LANE), lambda l, i: (0, 0)),
            scratch_shapes=[
                pltpu.VMEM((n_pad, LANE), bf16),   # h: layer input, rewritten in place
                pltpu.VMEM((n_pad, LANE), bf16),   # feat: W.h slab (bf16, cast once/layer)
                pltpu.VMEM((n_pad, 1), f32),       # a_dst column
                pltpu.VMEM((1, n_pad), f32),       # a_src laid out along lanes
            ],
        ),
        compiler_params=pltpu.CompilerParams(
            # Both axes must run sequentially on one core: layer l+1 consumes
            # every row tile of layer l through the VMEM-resident scratches.
            dimension_semantics=("arbitrary", "arbitrary"),
            vmem_limit_bytes=vmem_limit,
        ),
    )(x_p, adj_p, waug_stack, bias_stack, pool_p)

    return out[:g, :c_out_final]


# ----------------------------------------------------------------------------
# Pure-JAX f32 reference (tolerance baseline)
# ----------------------------------------------------------------------------
def _gat_layer_reference(x, adj, w, att_src, att_dst, bias, relu):
    h = x @ w
    a_src = h @ att_src.reshape(-1, 1)
    a_dst = h @ att_dst.reshape(-1, 1)
    e = a_dst + a_src.T
    e = jnp.where(e > 0, e, 0.2 * e)
    e = jnp.where(adj > 0, e, jnp.float32(-1e30))
    alpha = jax.nn.softmax(e, axis=-1)
    out = alpha @ h + bias
    return jnp.maximum(out, 0.0) if relu else out


def gnn_encoder_reference(x, adj, pool_mat, params):
    h = _gat_layer_reference(x, adj, *params[0], relu=True)
    h = _gat_layer_reference(h, adj, *params[1], relu=True)
    h = _gat_layer_reference(h, adj, *params[2], relu=False)
    return pool_mat @ h


# ----------------------------------------------------------------------------
# Parameter init / graph construction (plain JAX / numpy glue)
# ----------------------------------------------------------------------------
def init_gat_params(key, c_in, c_out):
    k_w, k_s, k_d = jax.random.split(key, 3)
    glorot_w = np.sqrt(2.0 / (c_in + c_out)).astype(np.float32)
    glorot_a = np.sqrt(2.0 / (1 + c_out)).astype(np.float32)
    w = jax.random.normal(k_w, (c_in, c_out), jnp.float32) * glorot_w
    att_src = jax.random.normal(k_s, (1, c_out), jnp.float32) * glorot_a
    att_dst = jax.random.normal(k_d, (1, c_out), jnp.float32) * glorot_a
    bias = jnp.zeros((1, c_out), jnp.float32)
    return (w, att_src, att_dst, bias)


def build_adjacency(edge_index, num_nodes):
    # adj[target, source] = 1, plus self-loops (GATConv default add_self_loops).
    adj = np.zeros((num_nodes, num_nodes), dtype=np.float32)
    src, dst = edge_index
    adj[dst, src] = 1.0
    np.fill_diagonal(adj, 1.0)
    return jnp.asarray(adj)


def build_pool_matrix(batch, num_graphs):
    n = batch.shape[0]
    pool = np.zeros((num_graphs, n), dtype=np.float32)
    for g in range(num_graphs):
        members = np.where(batch == g)[0]
        pool[g, members] = 1.0 / max(len(members), 1)
    return jnp.asarray(pool)


# ----------------------------------------------------------------------------
if __name__ == "__main__":
    key = jax.random.PRNGKey(0)

    num_nodes = 16
    num_graphs = 2
    in_channels = 6
    hidden_channels = 128   # matches the reference module
    out_channels = 16

    # Two graphs of 8 nodes each, bidirectional ring edges within each graph.
    src_list, dst_list = [], []
    nodes_per_graph = num_nodes // num_graphs
    for g in range(num_graphs):
        base = g * nodes_per_graph
        for i in range(nodes_per_graph):
            a = base + i
            b = base + (i + 1) % nodes_per_graph
            src_list += [a, b]
            dst_list += [b, a]
    edge_index = np.stack([np.array(src_list), np.array(dst_list)])   # [2, 32]
    batch = np.repeat(np.arange(num_graphs), nodes_per_graph)          # [16]

    adj = build_adjacency(edge_index, num_nodes)
    pool_mat = build_pool_matrix(batch, num_graphs)

    k_x, k1, k2, k3 = jax.random.split(key, 4)
    x = jax.random.normal(k_x, (num_nodes, in_channels), jnp.float32)

    params = (
        init_gat_params(k1, in_channels, hidden_channels),
        init_gat_params(k2, hidden_channels, hidden_channels),
        init_gat_params(k3, hidden_channels, out_channels),
    )

    out = gnn_encoder_forward(x, adj, pool_mat, params)
    out = jax.block_until_ready(out)
    ref = gnn_encoder_reference(x, adj, pool_mat, params)

    assert out.shape == (num_graphs, out_channels)
    assert bool(jnp.all(jnp.isfinite(out)))
    # bf16 weights/activations/aggregation + approx reciprocal -> loose tolerance.
    assert bool(jnp.allclose(out, ref, rtol=1.5e-1, atol=3e-2))
    print("KERNEL_OK")
</pallas_src>

<mosaic_0001>
module attributes {stable_mosaic.version = 11 : i64} {
  func.func @_fused_gnn_kernel(%arg0: i32, %arg1: i32, %arg2: memref<128x128xbf16, #tpu.memory_space<any>>, %arg3: memref<128x128xi8, #tpu.memory_space<vmem>>, %arg4: memref<1x128x256xbf16, #tpu.memory_space<vmem>>, %arg5: memref<1x1x128xf32, #tpu.memory_space<vmem>>, %arg6: memref<8x128xf32, #tpu.memory_space<vmem>>, %arg7: memref<8x128xf32, #tpu.memory_space<vmem>>, %arg8: memref<128x128xbf16, #tpu.memory_space<vmem>>, %arg9: memref<128x128xbf16, #tpu.memory_space<vmem>>, %arg10: memref<128x1xf32, #tpu.memory_space<vmem>>, %arg11: memref<1x128xf32, #tpu.memory_space<vmem>>) attributes {dimension_semantics = [#tpu.dimension_semantics<arbitrary>, #tpu.dimension_semantics<arbitrary>], iteration_bounds = array<i64: 3, 1>, scalar_prefetch = 0 : i64, scratch_operands = 4 : i64, tpu.core_type = #tpu.core_type<tc>, window_params = [{}, {transform_indices = @transform_1, window_bounds = array<i64: 128, 128>}, {transform_indices = @transform_2, window_bounds = array<i64: 1, 128, 256>}, {transform_indices = @transform_3, window_bounds = array<i64: 1, 1, 128>}, {transform_indices = @transform_4, window_bounds = array<i64: 8, 128>}, {pipeline_mode = #tpu.pipeline_mode<synchronous>, transform_indices = @transform_5, window_bounds = array<i64: 8, 128>}]} {
    %c128_i32 = arith.constant 128 : i32
    %0 = arith.muli %arg1, %c128_i32 : i32
    %1 = tpu.assume_multiple %0, 128 : i32
    %c0_i32 = arith.constant 0 : i32
    %2 = arith.cmpi eq, %arg0, %c0_i32 : i32
    %c0_i32_0 = arith.constant 0 : i32
    %3 = arith.cmpi eq, %arg1, %c0_i32_0 : i32
    %4 = arith.andi %2, %3 : i1
    %5 = arith.extui %4 : i1 to i32
    %c0_i32_1 = arith.constant 0 : i32
    %6 = arith.cmpi ne, %5, %c0_i32_1 : i32
    scf.if %6 {
      "tpu.region"() ({
        %55 = tpu.sem_alloc : memref<!tpu.dma_semaphore, #tpu.memory_space<semaphore_mem>>
        tpu.enqueue_dma source(%arg2 : memref<128x128xbf16, #tpu.memory_space<any>>) target(%arg8 : memref<128x128xbf16, #tpu.memory_space<vmem>>) target_semaphore(%55 : memref<!tpu.dma_semaphore, #tpu.memory_space<semaphore_mem>>)
        tpu.wait_dma2 semaphore(%55 : memref<!tpu.dma_semaphore, #tpu.memory_space<semaphore_mem>>) src(%arg2 : memref<128x128xbf16, #tpu.memory_space<any>>) dst(%arg8 : memref<128x128xbf16, #tpu.memory_space<vmem>>)
        tpu.yield
      }) : () -> ()
      %cst_22 = arith.constant 0.000000e+00 : f32
      %53 = vector.broadcast %cst_22 : f32 to vector<8x128xf32>
      %c0_23 = arith.constant 0 : index
      %c0_24 = arith.constant 0 : index
      %54 = vector.load %arg7[%c0_23, %c0_24] : memref<8x128xf32, #tpu.memory_space<vmem>>, vector<8x128xf32>
      tpu.vector_store %arg7[%c0_23, %c0_24], %53 {strides = array<i32>} : memref<8x128xf32, #tpu.memory_space<vmem>>, vector<8x128xf32>,
    } else {
    }
    %c0_i32_2 = arith.constant 0 : i32
    %7 = arith.cmpi eq, %arg1, %c0_i32_2 : i32
    %8 = arith.extui %7 : i1 to i32
    %c0_i32_3 = arith.constant 0 : i32
    %9 = arith.cmpi ne, %8, %c0_i32_3 : i32
    scf.if %9 {
      %c0_22 = arith.constant 0 : index
      %c0_23 = arith.constant 0 : index
      %53 = vector.load %arg8[%c0_22, %c0_23] : memref<128x128xbf16, #tpu.memory_space<vmem>>, vector<128x128xbf16>
      %c0_24 = arith.constant 0 : index
      %c0_25 = arith.constant 0 : index
      %c0_26 = arith.constant 0 : index
      %54 = vector.load %arg4[%c0_24, %c0_25, %c0_26] : memref<1x128x256xbf16, #tpu.memory_space<vmem>>, vector<1x128x256xbf16>
      %55 = vector.shape_cast %54 : vector<1x128x256xbf16> to vector<128x256xbf16>
      %cst_27 = arith.constant dense<0.000000e+00> : vector<128x256xf32>
      %56 = tpu.matmul %53, %55, %cst_27 {dimension_numbers = #tpu.dot_dimension_numbers<[1], [0], [0], [1], [0, 0, 1, 1], [], []>} : vector<128x128xbf16>, vector<128x256xbf16>, vector<128x256xf32> -> vector<128x256xf32>
      %57 = vector.extract_strided_slice %56 {offsets = [0, 0], sizes = [128, 128], strides = [1, 1]} : vector<128x256xf32> to vector<128x128xf32>
      %58 = arith.truncf %57 : vector<128x128xf32> to vector<128x128xbf16>
      %c0_28 = arith.constant 0 : index
      %c0_29 = arith.constant 0 : index
      %59 = vector.load %arg9[%c0_28, %c0_29] : memref<128x128xbf16, #tpu.memory_space<vmem>>, vector<128x128xbf16>
      tpu.vector_store %arg9[%c0_28, %c0_29], %58 {strides = array<i32>} : memref<128x128xbf16, #tpu.memory_space<vmem>>, vector<128x128xbf16>,
      %60 = vector.extract_strided_slice %56 {offsets = [0, 128], sizes = [128, 1], strides = [1, 1]} : vector<128x256xf32> to vector<128x1xf32>
      %c0_30 = arith.constant 0 : index
      %c0_31 = arith.constant 0 : index
      %61 = vector.load %arg10[%c0_30, %c0_31] : memref<128x1xf32, #tpu.memory_space<vmem>>, vector<128x1xf32>
      tpu.vector_store %arg10[%c0_30, %c0_31], %60 {strides = array<i32>} : memref<128x1xf32, #tpu.memory_space<vmem>>, vector<128x1xf32>,
      %62 = vector.extract_strided_slice %56 {offsets = [0, 128], sizes = [128, 128], strides = [1, 1]} : vector<128x256xf32> to vector<128x128xf32>
      %63 = tpu.transpose %62, [1, 0] : vector<128x128xf32> -> vector<128x128xf32>
      %64 = vector.extract_strided_slice %63 {offsets = [1, 0], sizes = [1, 128], strides = [1, 1]} : vector<128x128xf32> to vector<1x128xf32>
      %c0_32 = arith.constant 0 : index
      %c0_33 = arith.constant 0 : index
      %65 = vector.load %arg11[%c0_32, %c0_33] : memref<1x128xf32, #tpu.memory_space<vmem>>, vector<1x128xf32>
      tpu.vector_store %arg11[%c0_32, %c0_33], %64 {strides = array<i32>} : memref<1x128xf32, #tpu.memory_space<vmem>>, vector<1x128xf32>,
    } else {
    }
    %10 = arith.index_cast %1 : i32 to index
    %c0 = arith.constant 0 : index
    %11 = vector.load %arg10[%10, %c0] : memref<128x1xf32, #tpu.memory_space<vmem>>, vector<128x1xf32>
    %c0_4 = arith.constant 0 : index
    %c0_5 = arith.constant 0 : index
    %12 = vector.load %arg11[%c0_4, %c0_5] : memref<1x128xf32, #tpu.memory_space<vmem>>, vector<1x128xf32>
    %13 = vector.broadcast %11 : vector<128x1xf32> to vector<128x128xf32>
    %14 = vector.broadcast %12 : vector<1x128xf32> to vector<128x128xf32>
    %15 = arith.addf %13, %14 : vector<128x128xf32>
    %cst = arith.constant 0.000000e+00 : f32
    %16 = vector.broadcast %cst : f32 to vector<128x128xf32>
    %17 = arith.cmpf ogt, %15, %16 : vector<128x128xf32>
    %cst_6 = arith.constant 2.000000e-01 : f32
    %18 = vector.broadcast %cst_6 : f32 to vector<128x128xf32>
    %19 = arith.mulf %18, %15 : vector<128x128xf32>
    %20 = arith.select %17, %15, %19 : vector<128x128xi1>, vector<128x128xf32>
    %c0_7 = arith.constant 0 : index
    %c0_8 = arith.constant 0 : index
    %21 = vector.load %arg3[%c0_7, %c0_8] : memref<128x128xi8, #tpu.memory_space<vmem>>, vector<128x128xi8>
    %c0_i8 = arith.constant 0 : i8
    %22 = vector.broadcast %c0_i8 : i8 to vector<128x128xi8>
    %23 = arith.cmpi ne, %21, %22 : vector<128x128xi8>
    %cst_9 = arith.constant -1.000000e+30 : f32
    %24 = vector.broadcast %cst_9 : f32 to vector<128x128xf32>
    %25 = arith.select %23, %20, %24 : vector<128x128xi1>, vector<128x128xf32>
    %cst_10 = arith.constant dense<0xFF800000> : vector<128xf32>
    %26 = vector.multi_reduction <maximumf>, %25, %cst_10 [1] : vector<128x128xf32> to vector<128xf32>
    %27 = vector.shape_cast %26 : vector<128xf32> to vector<128x1xf32>
    %28 = vector.broadcast %27 : vector<128x1xf32> to vector<128x128xf32>
    %29 = arith.subf %25, %28 : vector<128x128xf32>
    %30 = math.exp %29 : vector<128x128xf32>
    %cst_11 = arith.constant dense<0.000000e+00> : vector<128xf32>
    %31 = vector.multi_reduction <add>, %30, %cst_11 [1] : vector<128x128xf32> to vector<128xf32>
    %32 = vector.shape_cast %31 : vector<128xf32> to vector<128x1xf32>
    %33 = arith.truncf %30 : vector<128x128xf32> to vector<128x128xbf16>
    %c0_12 = arith.constant 0 : index
    %c0_13 = arith.constant 0 : index
    %34 = vector.load %arg9[%c0_12, %c0_13] : memref<128x128xbf16, #tpu.memory_space<vmem>>, vector<128x128xbf16>
    %cst_14 = arith.constant dense<0.000000e+00> : vector<128x128xf32>
    %35 = tpu.matmul %33, %34, %cst_14 {dimension_numbers = #tpu.dot_dimension_numbers<[1], [0], [0], [1], [0, 0, 1, 1], [], []>} : vector<128x128xbf16>, vector<128x128xbf16>, vector<128x128xf32> -> vector<128x128xf32>
    %36 = tpu.reciprocal %32 {approx = true} : vector<128x1xf32> -> vector<128x1xf32>
    %37 = vector.broadcast %36 : vector<128x1xf32> to vector<128x128xf32>
    %38 = arith.mulf %35, %37 : vector<128x128xf32>
    %c0_15 = arith.constant 0 : index
    %c0_16 = arith.constant 0 : index
    %c0_17 = arith.constant 0 : index
    %39 = vector.load %arg5[%c0_15, %c0_16, %c0_17] : memref<1x1x128xf32, #tpu.memory_space<vmem>>, vector<1x1x128xf32>
    %40 = vector.shape_cast %39 : vector<1x1x128xf32> to vector<1x128xf32>
    %41 = vector.broadcast %40 : vector<1x128xf32> to vector<128x128xf32>
    %42 = arith.addf %38, %41 : vector<128x128xf32>
    %c2_i32 = arith.constant 2 : i32
    %43 = arith.cmpi slt, %arg0, %c2_i32 : i32
    %cst_18 = arith.constant 0.000000e+00 : f32
    %44 = vector.broadcast %cst_18 : f32 to vector<128x128xf32>
    %45 = arith.maximumf %42, %44 : vector<128x128xf32>
    %46 = arith.select %43, %45, %42 : vector<128x128xf32>
    %47 = arith.truncf %46 : vector<128x128xf32> to vector<128x128xbf16>
    %48 = arith.index_cast %1 : i32 to index
    %c0_19 = arith.constant 0 : index
    %49 = vector.load %arg8[%48, %c0_19] : memref<128x128xbf16, #tpu.memory_space<vmem>>, vector<128x128xbf16>
    tpu.vector_store %arg8[%48, %c0_19], %47 {strides = array<i32>} : memref<128x128xbf16, #tpu.memory_space<vmem>>, vector<128x128xbf16>,
    %c2_i32_20 = arith.constant 2 : i32
    %50 = arith.cmpi eq, %arg0, %c2_i32_20 : i32
    %51 = arith.extui %50 : i1 to i32
    %c0_i32_21 = arith.constant 0 : i32
    %52 = arith.cmpi ne, %51, %c0_i32_21 : i32
    scf.if %52 {
      %c0_22 = arith.constant 0 : index
      %c0_23 = arith.constant 0 : index
      %53 = vector.load %arg7[%c0_22, %c0_23] : memref<8x128xf32, #tpu.memory_space<vmem>>, vector<8x128xf32>
      %c0_24 = arith.constant 0 : index
      %c0_25 = arith.constant 0 : index
      %54 = vector.load %arg6[%c0_24, %c0_25] : memref<8x128xf32, #tpu.memory_space<vmem>>, vector<8x128xf32>
      %cst_26 = arith.constant dense<0.000000e+00> : vector<8x128xf32>
      %55 = tpu.matmul %54, %46, %cst_26 {dimension_numbers = #tpu.dot_dimension_numbers<[1], [0], [0], [1], [0, 0, 1, 1], [], []>} : vector<8x128xf32>, vector<128x128xf32>, vector<8x128xf32> -> vector<8x128xf32>
      %56 = arith.addf %53, %55 : vector<8x128xf32>
      %c0_27 = arith.constant 0 : index
      %c0_28 = arith.constant 0 : index
      %57 = vector.load %arg7[%c0_27, %c0_28] : memref<8x128xf32, #tpu.memory_space<vmem>>, vector<8x128xf32>
      tpu.vector_store %arg7[%c0_27, %c0_28], %56 {strides = array<i32>} : memref<8x128xf32, #tpu.memory_space<vmem>>, vector<8x128xf32>,
    } else {
    }
    return
  }
  func.func @transform_1(%arg0: i32, %arg1: i32) -> (i32, i32) {
    %c0_i32 = arith.constant 0 : i32
    %c0_i32_0 = arith.constant 0 : i32
    return %arg1, %c0_i32 : i32, i32
  }
  func.func @transform_2(%arg0: i32, %arg1: i32) -> (i32, i32, i32) {
    %c0_i32 = arith.constant 0 : i32
    %c0_i32_0 = arith.constant 0 : i32
    %c0_i32_1 = arith.constant 0 : i32
    return %arg0, %c0_i32, %c0_i32_0 : i32, i32, i32
  }
  func.func @transform_3(%arg0: i32, %arg1: i32) -> (i32, i32, i32) {
    %c0_i32 = arith.constant 0 : i32
    %c0_i32_0 = arith.constant 0 : i32
    %c0_i32_1 = arith.constant 0 : i32
    return %arg0, %c0_i32, %c0_i32_0 : i32, i32, i32
  }
  func.func @transform_4(%arg0: i32, %arg1: i32) -> (i32, i32) {
    %c0_i32 = arith.constant 0 : i32
    %c0_i32_0 = arith.constant 0 : i32
    return %c0_i32, %arg1 : i32, i32
  }
  func.func @transform_5(%arg0: i32, %arg1: i32) -> (i32, i32) {
    %c0_i32 = arith.constant 0 : i32
    %c0_i32_0 = arith.constant 0 : i32
    %c0_i32_1 = arith.constant 0 : i32
    return %c0_i32, %c0_i32_0 : i32, i32
  }
}

</mosaic_0001>

<bundles_post_ra>
// kernel: tpu_custom_call.1
= control target key start
LH: loop header
LB: loop body
LE: loop exit
PB: predicated region body
PF: predicated region fallthrough
CT: control target
= control target key end

     0   :  { %10 = vsyncpa [#allocation7], 0  ;;  %s2498_s0 = inlined_call_operand.hbm [shape: bf16[128,128], index: 0, kind: input, shape index: {}]   ;;  %s2499_s1 = inlined_call_operand.hbm [shape: s8[128,128], index: 1, kind: input, shape index: {}]   ;;  %s2500_s2 = inlined_call_operand.hbm [shape: bf16[3,128,256], index: 2, kind: input, shape index: {}]   ;;  %s2501_s3 = inlined_call_operand.vmem [shape: f32[3,1,128], index: 3, kind: input, shape index: {}]   ;;  %s2502_s4 = inlined_call_operand.vmem [shape: f32[8,128], index: 4, kind: input, shape index: {}]   ;;  %s2503_s5 = inlined_call_operand.hbm [shape: f32[8,128], index: 5, kind: output, shape index: {}]  }
   0x1   :  { %11 = vsyncpa [#allocation10], 0 }
   0x2   :  { %13 = vsyncpa [#allocation10 + $0x1], 0 }
   0x3   :  { %14 = vsyncpa [#allocation8], 0  ;;  %s1955_s18 = smov 0   ;;  %s1957_s19 = smov 0  }
   0x4   :  { %s1959_s20 = smov 0   ;;  %s1961_s21 = smov 0  }
   0x5   :  { %s1963_s22 = smov 0   ;;  %s1965_s23 = smov 0  }
   0x6 LB: > { %s1414_s24 = sadd.s32 4294967295, %s1912_s23   ;;  %p78_p0 = scmp.ne.s32.totalorder %s1896_s19, %s1892_s18  ;;  %s1912_s23 = sphi %s1965_s23, %s20_s23   ;;  %s1908_s22 = sphi %s1963_s22, %s2533_s22   ;;  %s1904_s21 = sphi %s1961_s21, %s2532_s21   ;;  %s1900_s20 = sphi %s1959_s20, %s2531_s20   ;;  %s1896_s19 = sphi %s1957_s19, %s2530_s19   ;;  %s1892_s18 = sphi %s1955_s18, %s2529_s18  }
   0x7   : > { %p1987_p1 = scmp.eq.s32.totalorder %s1414_s24, 0  ;;  %p1415_p2 = scmp.ge.s32.totalorder %s1912_s23, 1 }
   0x8   : > { %p162_p3 = scmp.lt.s32.totalorder %s1912_s23, 4  ;;  %s1914_s28 = smov [#allocation6]  }
   0x9   : > { %s2508_s25 = scalar_select %p1987_p1, 1, 0 }
   0xa   : > { %p1995_p4 = por %p1987_p1, %p78_p0  ;;  %p1999_p5 = pnand %p1415_p2, %p162_p3 }
   0xb   : > { %s177_s29 = sshll.u32 %s1914_s28, 4  ;;  %s32_s6 = sadd.s32 1, %s1908_s22  ;;  %s178_s29 = int_to_ptr.vmem [resolvable:$true] %s177_s29 }
   0xc   : > { %s2509_s26 = scalar_select %p1995_p4, 1, 0 }
   0xd   : > { %s2510_s27 = scalar_select %p1999_p5, 1, 0 }
   0xe   : > { %p1585_p6 = pneg %p1999_p5  ;;  %s1746_s9 = scalar_lea.hbm %s2499_s1, 512 }
   0xf   : > { %p1747_p8 = scmp.ne.s32.totalorder %s2499_s1, %s1746_s9  ;;  %p1753_p12 = scmp.lt.u32.totalorder %s1746_s9, %s2499_s1 }
  0x10   : > { %p2007_p7 = pnand %p1585_p6, %p1987_p1 }
  0x12   : > { %p1748_p9 = pneg %p2007_p7 }
  0x14   : > { %p1749_p10 = pnand %p1748_p9, %p1747_p8 }
  0x16   : > { %p1750_p11 = pneg %p1749_p10 }
  0x18   : > { %p1755_p13 = pnand %p1753_p12, %p1750_p11 }
  0x1a   : > { %1758 = shalt.err (!%p1755_p13)
}
  0x1b   : > { %s1759_s14 = scalar_lea.vmem %s178_s29, 512  ;;  %p1767_p6 = scmp.lt.s32.totalorder %s178_s29, %s178_s29 }
  0x1c   : > { %p1760_p0 = scmp.ne.s32.totalorder %s178_s29, %s1759_s14  ;;  %p1768_p4 = scmp.lt.s32.totalorder %s1759_s14, %s1759_s14 }
  0x1e   : > { %p1762_p2 = pnand %p1760_p0, %p1748_p9  ;;  %p1769_p1 = por %p1768_p4, %p1767_p6 }
  0x20   : > { %p1763_p3 = pneg %p1762_p2 }
  0x22   : > { %p1770_p5 = pnand %p1769_p1, %p1763_p3 }
  0x24   : > { %1773 = shalt.err (!%p1770_p5)
}
  0x25   : > { %s1915_s15 = smov 128   ;;  %s1916_s16 = smov 8  }
  0x26   : > { %1588 = dma.hbm_to_vmem [thread:$0]  (!%p2007_p7), %s2499_s1, 512, %s178_s29, [#allocation7], %s1915_s15, %s1915_s15, %s1916_s16  }
  0x27   : > { %p34_p1 = scmp.ge.s32.totalorder %s32_s6, 3  ;;  %s65_s28 = sadd.s32 1, %s1900_s20 }
  0x28   : > { %p72_p4 = scmp.ne.s32.totalorder %s1900_s20, %s1896_s19  ;;  %p73_p5 = scmp.eq.s32.totalorder %s1912_s23, 0 }
  0x29   : > { %s2535_s6 = smov (%p34_p1, %s32_s6), 0  ;;  %p1594_p9 = scmp.lt.s32.totalorder %s1912_s23, 3 }
  0x2a   : > { %p74_p8 = por %p73_p5, %p72_p4  ;;  %s62_s7 = ssub.s32 %s1908_s22, %s2535_s6 }
  0x2b   : > { %s198_s8 = sand.u32 1, %s1900_s20   ;;  %p63_p10 = scmp.eq.s32.totalorder %s62_s7, 0 }
  0x2c   : > { %s1419_s30 = sshll.u32 %s198_s8, 7  ;;  %s1449_s9 = sshll.u32 %s1908_s22, 11 }
  0x2d   : > { %s2043_s10 = scalar_select %p63_p10, %s1900_s20, %s65_s28  }
  0x2e   : > { %s2048_s29 = scalar_lea.hbm %s2500_s2, %s1449_s9  ;;  %s202_s13 = scalar_lea.vmem [#allocation9], %s1419_s30 }
  0x2f   : > { %s209_s14 = sshll.u32 %s202_s13, 4  ;;  %p2050_p7 = pnand %p1594_p9, %p74_p8  ;;  %s2054_s14 = int_to_ptr.vmem [resolvable:$true] %s209_s14 }
  0x30   : > { %s2056_s18 = scalar_lea.sflag [#allocation10], %s198_s8  ;;  %s1774_s28 = scalar_lea.hbm %s2048_s29, 2048 }
  0x31   : > { %p1775_p11 = scmp.ne.s32.totalorder %s2048_s29, %s1774_s28  ;;  %p1776_p12 = pneg %p2050_p7 }
  0x32   : > { %s1779_s9 = scalar_lea.hbm %s2500_s2, 6144  ;;  %p1780_p2 = scmp.lt.u32.totalorder %s2048_s29, %s2500_s2 }
  0x33   : > { %p1777_p13 = pnand %p1776_p12, %p1775_p11  ;;  %p1781_p3 = scmp.lt.u32.totalorder %s1779_s9, %s1774_s28 }
  0x34   : > { %p1783_p1 = scmp.lt.u32.totalorder %s1774_s28, %s2048_s29 }
  0x35   : > { %p1778_p0 = pneg %p1777_p13  ;;  %p1782_p6 = por %p1781_p3, %p1780_p2 }
  0x37   : > { %p1784_p4 = por %p1783_p1, %p1782_p6 }
  0x39   : > { %p1785_p5 = pnand %p1784_p4, %p1778_p0 }
  0x3b   : > { %1788 = shalt.err (!%p1785_p5)
}
  0x3c   : > { %s1789_s8 = scalar_lea.vmem %s2054_s14, 2048  ;;  %s1917_s13 = smov [#allocation9]  }
  0x3d   : > { %p1790_p8 = scmp.ne.s32.totalorder %s2054_s14, %s1789_s8  ;;  %s1794_s7 = sshll.u32 %s1917_s13, 4  ;;  %s1795_s7 = int_to_ptr.vmem [resolvable:$false] %s1794_s7 }
  0x3e   : > { %s1796_s30 = scalar_lea.vmem %s1795_s7, 4096  ;;  %p1797_p11 = scmp.lt.s32.totalorder %s2054_s14, %s1795_s7 }
  0x3f   : > { %p1792_p9 = pnand %p1790_p8, %p1776_p12  ;;  %p1798_p13 = scmp.lt.s32.totalorder %s1796_s30, %s1789_s8 }
  0x41   : > { %p1793_p10 = pneg %p1792_p9  ;;  %p1799_p2 = por %p1798_p13, %p1797_p11 }
  0x43   : > { %p1800_p3 = pnand %p1799_p2, %p1793_p10 }
  0x45   : > { %1803 = shalt.err (!%p1800_p3)
}
  0x46   : > { %1592 = dma.hbm_to_vmem [thread:$0]  (!%p2050_p7), %s2048_s29, 2048, %s2054_s14, %s2056_s18, %s1915_s15, %s1915_s15, %s1916_s16  }
  0x47   : > { %p2513_p12 = scmp.ne.s32.totalorder %s2510_s27, 0 }
  0x48   : > { %p2514_p0 = scmp.ne.s32.totalorder (!%p2513_p12), %s2508_s25, 0 }
  0x49   : > { %227 = sbr.rel (%p2513_p12) target bundleno = 1287 (0x507), region = 36 }
  0x50   : > { %1877 = dma.done.wait (%p2514_p0), [#allocation7], 512  }
  0x51   : > { %1879 = vsyncadd (%p2514_p0), [#allocation7], 4294966784  ;;  %s233_s28 = sand.u32 1, %s1896_s19   ;;  %p2515_p6 = scmp.ne.s32.totalorder %s2509_s26, 0 }
  0x52   : > { %s1424_s17 = sshll.u32 %s233_s28, 7  ;;  %s234_s9 = scalar_lea.sflag [#allocation10], %s233_s28 }
  0x53   : > { %s2094_s11 = scalar_lea.vmem [#allocation9], %s1424_s17 }
  0x54   : > { %1881 = dma.done.wait (%p2515_p6), %s234_s9, 2048  }
  0x55   : > { %1883 = vsyncadd (%p2515_p6), %s234_s9, 4294965248  ;;  %p265_p7 = scmp.lt.s32.totalorder %s1904_s21, 2  ;;  %p276_p1 = scmp.eq.s32.totalorder %s1904_s21, 0 }
  0x57   : > { %s2105_s25 = scalar_select %p265_p7, %s1904_s21, 2 }
  0x58   : > { %281 = sbr.rel (!%p276_p1) target bundleno = 114 (0x72), region = 48 }
  0x59   : > { %s267_s16 = scalar_lea.vmem %s2501_s3, %s2105_s25 }
  0x5f   : > { %s1918_s29 = smov [#allocation2]   ;;  %s1804_s12 = scalar_lea.hbm %s2498_s0, 1024 }
  0x60   : > { %s289_s14 = sshll.u32 %s1918_s29, 4  ;;  %p1805_p4 = scmp.ne.s32.totalorder %s2498_s0, %s1804_s12  ;;  %s290_s14 = int_to_ptr.vmem [resolvable:$true] %s289_s14 }
  0x61   : > { %p1808_p5 = scmp.lt.u32.totalorder %s1804_s12, %s2498_s0 }
  0x63   : > { %p1810_p8 = pnand %p1808_p5, %p1805_p4 }
  0x65   : > { %1813 = shalt.err (!%p1810_p8)  }
  0x66   : > { %s1814_s28 = scalar_lea.vmem %s290_s14, 1024  ;;  %p1819_p10 = scmp.lt.s32.totalorder %s290_s14, %s290_s14 }
  0x67   : > { %p1815_p9 = scmp.ne.s32.totalorder %s290_s14, %s1814_s28  ;;  %p1820_p11 = scmp.lt.s32.totalorder %s1814_s28, %s1814_s28 }
  0x69   : > { %p1821_p13 = por %p1820_p11, %p1819_p10 }
  0x6b   : > { %p1822_p2 = pnand %p1821_p13, %p1815_p9 }
  0x6d   : > { %1825 = shalt.err (!%p1822_p2)  }
  0x6e   : > { %292 = dma.hbm_to_vmem [thread:$0]  %s2498_s0, 1024, %s290_s14, [#allocation12] }
  0x6f   : > { %1884 = dma.done.wait [#allocation12], 1024 }
  0x70   : > { %1885 = vsyncadd [#allocation12], 4294966272  ;;  %v1919_v0 = vmov 0.0  }
  0x71   : > { %297 = vst [vmem:[#allocation11] sm:$0xff] %v1919_v0 }
  0x72 PF: > { %v1658_v1 = vld [vmem:[%s2094_s11 + $0x4] ss:$8 sps:$4 sm:$0xff]   ;;  %v1660_v2 = vld [vmem:[%s2094_s11] ss:$8 sps:$4 sm:$0xff]   ;;  %v1920_v3 = vmov 0   ;;  %v304_v21 = vld [vmem:[#allocation2 + $0x18] sm:$0xff] }
  0x73   : > { %437 = vmatprep.mubr.bf16.mxu0 %v1920_v3  ;;  %1656 = vset.pattern.permute.xlu0 %v1920_v3  ;;  %v1661_v4 = vld [vmem:[%s2094_s11 + $0x14] ss:$8 sps:$4 sm:$0xff]   ;;  %v1663_v5 = vld [vmem:[%s2094_s11 + $0x10] ss:$8 sps:$4 sm:$0xff]   ;;  %v1664_v6 = vld [vmem:[%s2094_s11 + $0x24] ss:$8 sps:$4 sm:$0xff]  }
  0x74   : > { %405 = vmatprep.subr.bf16.mxu0 %v1658_v1  ;;  %1657 = vset.pattern.permute.xlu1 %v1920_v3  ;;  %v1666_v7 = vld [vmem:[%s2094_s11 + $0x20] ss:$8 sps:$4 sm:$0xff]   ;;  %v1667_v8 = vld [vmem:[%s2094_s11 + $0x34] ss:$8 sps:$4 sm:$0xff]   ;;  %v1669_v9 = vld [vmem:[%s2094_s11 + $0x30] ss:$8 sps:$4 sm:$0xff]  }
  0x75   : > { %406 = vmatpush1.bf16.msra.mxu0 %v1660_v2  ;;  %v1670_v10 = vld [vmem:[%s2094_s11 + $0x44] ss:$8 sps:$4 sm:$0xff]   ;;  %v1672_v11 = vld [vmem:[%s2094_s11 + $0x40] ss:$8 sps:$4 sm:$0xff]   ;;  %v1673_v12 = vld [vmem:[%s2094_s11 + $0x54] ss:$8 sps:$4 sm:$0xff]  }
  0x76   : > { %407 = vmatprep.subr.bf16.mxu0 %v1661_v4  ;;  %v1675_v13 = vld [vmem:[%s2094_s11 + $0x50] ss:$8 sps:$4 sm:$0xff]   ;;  %v1676_v14 = vld [vmem:[%s2094_s11 + $0x64] ss:$8 sps:$4 sm:$0xff]   ;;  %v1678_v15 = vld [vmem:[%s2094_s11 + $0x60] ss:$8 sps:$4 sm:$0xff]  }
  0x77   : > { %v1679_v16 = vld [vmem:[%s2094_s11 + $0x74] ss:$8 sps:$4 sm:$0xff]   ;;  %v1681_v17 = vld [vmem:[%s2094_s11 + $0x70] ss:$8 sps:$4 sm:$0xff]   ;;  %v302_v19 = vld [vmem:[#allocation2 + $0x8] sm:$0xff]  ;;  %vm534_vm0 = vcmask 7168  }
  0x78   : > { %v301_v18 = vld [vmem:[#allocation2] sm:$0xff]  ;;  %v303_v20 = vld [vmem:[#allocation2 + $0x10] sm:$0xff]  ;;  %v306_v23 = vld [vmem:[#allocation2 + $0x28] sm:$0xff]  ;;  %s1189_s11 = scalar_select %p265_p7, 1, 0 }
  0x79   : > { %408 = vmatpush1.bf16.msra.mxu0 %v1663_v5  ;;  %v305_v22 = vld [vmem:[#allocation2 + $0x20] sm:$0xff]  ;;  %v307_v24 = vld [vmem:[#allocation2 + $0x30] sm:$0xff]  ;;  %v308_v25 = vld [vmem:[#allocation2 + $0x38] sm:$0xff]  ;;  %p1444_p3 = scmp.ne.s32.totalorder %s1904_s21, 2 }
  0x7a   : > { %409 = vmatprep.subr.bf16.mxu0 %v1664_v6 }
  0x7d   : > { %410 = vmatpush1.bf16.msra.mxu0 %v1666_v7 }
  0x7e   : > { %411 = vmatprep.subr.bf16.mxu0 %v1667_v8 }
  0x81   : > { %412 = vmatpush1.bf16.msra.mxu0 %v1669_v9 }
  0x82   : > { %413 = vmatprep.subr.bf16.mxu0 %v1670_v10 }
  0x85   : > { %414 = vmatpush1.bf16.msra.mxu0 %v1672_v11 }
  0x86   : > { %415 = vmatprep.subr.bf16.mxu0 %v1673_v12 }
  0x89   : > { %416 = vmatpush1.bf16.msra.mxu0 %v1675_v13 }
  0x8a   : > { %417 = vmatprep.subr.bf16.mxu0 %v1676_v14 }
  0x8d   : > { %418 = vmatpush1.bf16.msra.mxu0 %v1678_v15 }
  0x8e   : > { %419 = vmatprep.subr.bf16.mxu0 %v1679_v16 }
  0x91   : > { %420 = vmatpush1.bf16.msra.mxu0 %v1681_v17 }
  0x94   : > { %438 = vmatmul.mubr.bf16.vlgmr.msra.gmra.mrb[0].mxu0 %v301_v18 }
  0x95   : > { %447 = vmatprep.mubr.bf16.mxu0 %v1920_v3 }
  0x9c   : > { %448 = vmatmul.mubr.bf16.gmra.mrb[4].mxu0 %v302_v19 }
  0x9d   : > { %457 = vmatprep.mubr.bf16.mxu0 %v1920_v3 }
  0xa4   : > { %458 = vmatmul.mubr.bf16.gmra.mrb[8].mxu0 %v303_v20 }
  0xa5   : > { %467 = vmatprep.mubr.bf16.mxu0 %v1920_v3 }
  0xac   : > { %468 = vmatmul.mubr.bf16.gmra.mrb[12].mxu0 %v304_v21  ;;  %v754_v21 = vld [vmem:[#allocation6 + $0x10] sm:$0xff] }
  0xad   : > { %477 = vmatprep.mubr.bf16.mxu0 %v1920_v3  ;;  %vm758_vm1 = vnez %v754_v21 }
  0xb4   : > { %478 = vmatmul.mubr.bf16.gmra.mrb[16].mxu0 %v305_v22  ;;  %v752_v22 = vld [vmem:[#allocation6] sm:$0xff] }
  0xb5   : > { %487 = vmatprep.mubr.bf16.mxu0 %v1920_v3  ;;  %vm756_vm2 = vnez %v752_v22 }
  0xbc   : > { %488 = vmatmul.mubr.bf16.gmra.mrb[20].mxu0 %v306_v23 }
  0xbd   : > { %497 = vmatprep.mubr.bf16.mxu0 %v1920_v3 }
  0xc4   : > { %498 = vmatmul.mubr.bf16.gmra.mrb[24].mxu0 %v307_v24 }
  0xc5   : > { %507 = vmatprep.mubr.bf16.mxu0 %v1920_v3 }
  0xcc   : > { %508 = vmatmul.mubr.bf16.gmra.mrb[28].mxu0 %v308_v25  ;;  %v2200_v25 = vsel %vm758_vm1, 16843009, %v1920_v3 }
 0x167   : > { %v439_v26 = vpop.f32.mrb[0].mxu0 }
 0x168   : > { %v2149_v27 = vpop.f32.mrb[1].mxu0 }
 0x169   : > { %535 = vst.msk [vmem:[#allocation4] sm:$0xff] %vm534_vm0, %v2149_v27  ;;  %v443_v28 = vpop.f32.mrb[2].mxu0 }
 0x16a   : > { %v518_v29 = vpack.c.bf16 %v443_v28, %v439_v26  ;;  %v2153_v30 = vpop.f32.mrb[3].mxu0  ;;  %v760_v26 = vsel %vm756_vm2, 16843009, %v1920_v3  ;;  %v775_v28 = vunpack.c.3.s8 %v2200_v25 }
 0x16b   : > { %536 = vst.msk [vmem:[#allocation4 + $0x8] sm:$0xff] %vm534_vm0, %v2153_v30 }
 0x16c   : > { %1484 = vmatprep.subr.bf16.mxu1 %v518_v29 }
 0x16d   : > { %1485 = vmatpush3.bf16.msra.mxu1 %v518_v29  ;;  %v764_v29 = vunpack.c.0.s8 %v760_v26 }
 0x16f   : > { %v449_v31 = vpop.f32.mrb[4].mxu0 }
 0x170   : > { %v2157_v32 = vpop.f32.mrb[5].mxu0  ;;  %v585_v33 = vld [vmem:[#allocation4] sm:$0xff] }
 0x171   : > { %537 = vst.msk [vmem:[#allocation4 + $0x10] sm:$0xff] %vm534_vm0, %v2157_v32  ;;  %604 = vperm.xlu0 %1656, %v585_v33   ;;  %v453_v34 = vpop.f32.mrb[6].mxu0  ;;  %v753_v33 = vld [vmem:[#allocation6 + $0x8] sm:$0xff] }
 0x172   : > { %v519_v35 = vpack.c.bf16 %v453_v34, %v449_v31  ;;  %v2161_v36 = vpop.f32.mrb[7].mxu0  ;;  %v586_v37 = vld [vmem:[#allocation4 + $0x8] sm:$0xff]  ;;  %v802_v34 = vpack.c.b16 %v775_v28, %v775_v28  ;;  %vm757_vm3 = vnez %v753_v33 }
 0x173   : > { %538 = vst.msk [vmem:[#allocation4 + $0x18] sm:$0xff] %vm534_vm0, %v2161_v36 }
 0x174   : > { %1486 = vmatprep.subr.bf16.mxu1 %v519_v35 }
 0x175   : > { %609 = vperm.xlu0 %1656, %v586_v37   ;;  %1487 = vmatpush3.bf16.msra.mxu1 %v519_v35  ;;  %v780_v35 = vpack.c.b16 %v764_v29, %v764_v29 }
 0x177   : > { %v459_v38 = vpop.f32.mrb[8].mxu0 }
 0x178   : > { %v2165_v39 = vpop.f32.mrb[9].mxu0  ;;  %v587_v40 = vld [vmem:[#allocation4 + $0x10] sm:$0xff] }
 0x179   : > { %539 = vst.msk [vmem:[#allocation4 + $0x20] sm:$0xff] %vm534_vm0, %v2165_v39  ;;  %614 = vperm.xlu1 %1657, %v587_v40   ;;  %v463_v41 = vpop.f32.mrb[10].mxu0  ;;  %v803_v40 = vpack.c.b8 %v802_v34, %v802_v34 }
 0x17a   : > { %v520_v42 = vpack.c.bf16 %v463_v41, %v459_v38  ;;  %v2169_v43 = vpop.f32.mrb[11].mxu0  ;;  %v588_v44 = vld [vmem:[#allocation4 + $0x18] sm:$0xff]  ;;  %v781_v41 = vpack.c.b8 %v780_v35, %v780_v35  ;;  %v772_v35 = vunpack.c.0.s8 %v2200_v25 }
 0x17b   : > { %540 = vst.msk [vmem:[#allocation4 + $0x28] sm:$0xff] %vm534_vm0, %v2169_v43  ;;  %vm823_vm4 = vnez %v803_v40 }
 0x17c   : > { %1488 = vmatprep.subr.bf16.mxu1 %v520_v42  ;;  %vm812_vm5 = vnez %v781_v41 }
 0x17d   : > { %619 = vperm.xlu1 %1657, %v588_v44   ;;  %1489 = vmatpush3.bf16.msra.mxu1 %v520_v42  ;;  %v2215_v44 = vsel %vm757_vm3, 16843009, %v1920_v3 }
 0x17f   : > { %v469_v45 = vpop.f32.mrb[12].mxu0 }
 0x180   : > { %v2173_v46 = vpop.f32.mrb[13].mxu0  ;;  %v589_v47 = vld [vmem:[#allocation4 + $0x20] sm:$0xff] }
 0x181   : > { %541 = vst.msk [vmem:[#allocation4 + $0x30] sm:$0xff] %vm534_vm0, %v2173_v46  ;;  %624 = vperm.xlu0 %1656, %v589_v47   ;;  %v473_v48 = vpop.f32.mrb[14].mxu0 }
 0x182   : > { %v521_v49 = vpack.c.bf16 %v473_v48, %v469_v45  ;;  %v2177_v50 = vpop.f32.mrb[15].mxu0  ;;  %v590_v51 = vld [vmem:[#allocation4 + $0x28] sm:$0xff]  ;;  %v768_v48 = vunpack.c.0.s8 %v2215_v44 }
 0x183   : > { %542 = vst.msk [vmem:[#allocation4 + $0x38] sm:$0xff] %vm534_vm0, %v2177_v50  ;;  %629 = vperm.xlu1 %1657, %v590_v51  }
 0x184   : > { %1490 = vmatprep.subr.bf16.mxu1 %v521_v49 }
 0x185   : > { %1491 = vmatpush3.bf16.msra.mxu1 %v521_v49 }
 0x187   : > { %v479_v52 = vpop.f32.mrb[16].mxu0 }
 0x188   : > { %v481_v53 = vpop.f32.mrb[17].mxu0  ;;  %v591_v54 = vld [vmem:[#allocation4 + $0x30] sm:$0xff] }
 0x189   : > { %543 = vst.msk [vmem:[#allocation4 + $0x40] sm:$0xff] %vm534_vm0, %v481_v53  ;;  %634 = vperm.xlu0 %1656, %v591_v54   ;;  %v483_v55 = vpop.f32.mrb[18].mxu0  ;;  %v788_v54 = vpack.c.b16 %v768_v48, %v768_v48 }
 0x18a   : > { %v522_v56 = vpack.c.bf16 %v483_v55, %v479_v52  ;;  %v485_v57 = vpop.f32.mrb[19].mxu0  ;;  %v592_v58 = vld [vmem:[#allocation4 + $0x38] sm:$0xff]  ;;  %v839_v52 = vsel %vm823_vm4, 16843009, %v1920_v3 }
 0x18b   : > { %544 = vst.msk [vmem:[#allocation4 + $0x48] sm:$0xff] %vm534_vm0, %v485_v57  ;;  %639 = vperm.xlu1 %1657, %v592_v58  }
 0x18c   : > { %1492 = vmatprep.subr.bf16.mxu1 %v522_v56 }
 0x18d   : > { %1493 = vmatpush3.bf16.msra.mxu1 %v522_v56  ;;  %v855_v56 = vunpack.c.0.s8 %v839_v52 }
 0x18f   : > { %v489_v59 = vpop.f32.mrb[20].mxu0  ;;  %vm871_vm10 = vcmp.ne.s32.totalorder %v855_v56, 0 }
 0x190   : > { %v491_v60 = vpop.f32.mrb[21].mxu0  ;;  %v593_v61 = vld [vmem:[#allocation4 + $0x40] sm:$0xff] }
 0x191   : > { %545 = vst.msk [vmem:[#allocation4 + $0x50] sm:$0xff] %vm534_vm0, %v491_v60  ;;  %644 = vperm.xlu0 %1656, %v593_v61   ;;  %v493_v62 = vpop.f32.mrb[22].mxu0 }
 0x192   : > { %v523_v63 = vpack.c.bf16 %v493_v62, %v489_v59  ;;  %v495_v0 = vpop.f32.mrb[23].mxu0  ;;  %v594_v1 = vld [vmem:[#allocation4 + $0x48] sm:$0xff] }
 0x193   : > { %546 = vst.msk [vmem:[#allocation4 + $0x58] sm:$0xff] %vm534_vm0, %v495_v0  ;;  %649 = vperm.xlu1 %1657, %v594_v1  }
 0x194   : > { %1494 = vmatprep.subr.bf16.mxu1 %v523_v63 }
 0x195   : > { %1495 = vmatpush3.bf16.msra.mxu1 %v523_v63 }
 0x197   : > { %v499_v2 = vpop.f32.mrb[24].mxu0 }
 0x198   : > { %v595_v4 = vld [vmem:[#allocation4 + $0x50] sm:$0xff]  ;;  %v501_v5 = vpop.f32.mrb[25].mxu0 }
 0x199   : > { %654 = vperm.xlu0 %1656, %v595_v4   ;;  %547 = vst.msk [vmem:[#allocation4 + $0x60] sm:$0xff] %vm534_vm0, %v501_v5  ;;  %v503_v6 = vpop.f32.mrb[26].mxu0 }
 0x19a   : > { %v596_v7 = vld [vmem:[#allocation4 + $0x58] sm:$0xff]  ;;  %v524_v8 = vpack.c.bf16 %v503_v6, %v499_v2  ;;  %v505_v9 = vpop.f32.mrb[27].mxu0 }
 0x19b   : > { %659 = vperm.xlu1 %1657, %v596_v7   ;;  %548 = vst.msk [vmem:[#allocation4 + $0x68] sm:$0xff] %vm534_vm0, %v505_v9 }
 0x19c   : > { %1496 = vmatprep.subr.bf16.mxu1 %v524_v8 }
 0x19d   : > { %1497 = vmatpush3.bf16.msra.mxu1 %v524_v8 }
 0x19f   : > { %v509_v10 = vpop.f32.mrb[28].mxu0 }
 0x1a0   : > { %v511_v11 = vpop.f32.mrb[29].mxu0  ;;  %v597_v12 = vld [vmem:[#allocation4 + $0x60] sm:$0xff] }
 0x1a1   : > { %549 = vst.msk [vmem:[#allocation4 + $0x70] sm:$0xff] %vm534_vm0, %v511_v11  ;;  %664 = vperm.xlu1 %1657, %v597_v12   ;;  %v513_v13 = vpop.f32.mrb[30].mxu0 }
 0x1a2   : > { %v525_v14 = vpack.c.bf16 %v513_v13, %v509_v10  ;;  %v515_v15 = vpop.f32.mrb[31].mxu0  ;;  %v598_v16 = vld [vmem:[#allocation4 + $0x68] sm:$0xff] }
 0x1a3   : > { %550 = vst.msk [vmem:[#allocation4 + $0x78] sm:$0xff] %vm534_vm0, %v515_v15 }
 0x1a4   : > { %1498 = vmatprep.subr.bf16.mxu1 %v525_v14 }
 0x1a5   : > { %669 = vperm.xlu1 %1657, %v598_v16   ;;  %1499 = vmatpush3.bf16.msra.mxu1 %v525_v14 }
 0x1a8   : > { %v599_v17 = vld [vmem:[#allocation4 + $0x70] sm:$0xff] }
 0x1a9   : > { %674 = vperm.xlu1 %1657, %v599_v17  }
 0x1aa   : > { %v600_v18 = vld [vmem:[#allocation4 + $0x78] sm:$0xff] }
 0x1ad   : > { %679 = vperm.xlu1 %1657, %v600_v18  }
 0x1b7   : > { %551 = vxpose.xlu0.b32.start [1/16] (narrow) %v2149_v27, 8 }
 0x1bb   : > { %552 = vxpose.xlu0.b32.cont [2/16] (narrow) %v2153_v30, 8 }
 0x1bf   : > { %553 = vxpose.xlu0.b32.cont [3/16] (narrow) %v2157_v32, 8  ;;  %v765_v32 = vunpack.c.1.s8 %v760_v26 }
 0x1c3   : > { %554 = vxpose.xlu0.b32.cont [4/16] (narrow) %v2161_v36, 8  ;;  %v766_v36 = vunpack.c.2.s8 %v760_v26 }
 0x1c5   : > { %v784_v42 = vpack.c.b16 %v766_v36, %v766_v36 }
 0x1c7   : > { %555 = vxpose.xlu0.b32.cont [5/16] (narrow) %v2165_v39, 8  ;;  %v782_v39 = vpack.c.b16 %v765_v32, %v765_v32  ;;  %v785_v49 = vpack.c.b8 %v784_v42, %v784_v42  ;;  %v773_v42 = vunpack.c.1.s8 %v2200_v25 }
 0x1c9   : > { %v783_v47 = vpack.c.b8 %v782_v39, %v782_v39  ;;  %vm814_vm7 = vnez %v785_v49 }
 0x1ca   : > { %v830_v63 = vsel %vm814_vm7, 16843009, %v1920_v3 }
 0x1cb   : > { %556 = vxpose.xlu0.b32.cont [6/16] (narrow) %v2169_v43, 8  ;;  %v767_v43 = vunpack.c.3.s8 %v760_v26  ;;  %vm813_vm6 = vnez %v783_v47  ;;  %v755_v47 = vld [vmem:[#allocation6 + $0x18] sm:$0xff] }
 0x1cc   : > { %v829_v58 = vsel %vm813_vm6, 16843009, %v1920_v3 }
 0x1cd   : > { %v845_v2 = vunpack.c.0.s8 %v829_v58 }
 0x1cf   : > { %557 = vxpose.xlu0.b32.cont [7/16] (narrow) %v2173_v46, 8  ;;  %vm861_vm15 = vcmp.ne.s32.totalorder %v845_v2, 0 }
 0x1d3   : > { %558 = vxpose.xlu0.b32.cont [8/16] (narrow) %v2177_v50, 8  ;;  %v786_v50 = vpack.c.b16 %v767_v43, %v767_v43 }
 0x1d5   : > { %v787_v55 = vpack.c.b8 %v786_v50, %v786_v50 }
 0x1d7   : > { %559 = vxpose.xlu0.b32.cont [9/16] (narrow) %v481_v53, 8  ;;  %v828_v53 = vsel %vm812_vm5, 16843009, %v1920_v3  ;;  %vm2231_vm8 = vnez %v787_v55 }
 0x1db   : > { %560 = vxpose.xlu0.b32.cont [10/16] (narrow) %v485_v57, 8  ;;  %v844_v57 = vunpack.c.0.s8 %v828_v53  ;;  %v798_v53 = vpack.c.b16 %v773_v42, %v773_v42 }
 0x1dd   : > { %vm860_vm12 = vcmp.ne.s32.totalorder %v844_v57, 0 }
 0x1df   : > { %561 = vxpose.xlu0.b32.cont [11/16] (narrow) %v491_v60, 8 }
 0x1e3   : > { %562 = vxpose.xlu0.b32.cont [12/16] (narrow) %v495_v0, 8  ;;  %v789_v0 = vpack.c.b8 %v788_v54, %v788_v54  ;;  %v774_v54 = vunpack.c.2.s8 %v2200_v25 }
 0x1e5   : > { %vm2238_vm14 = vnez %v789_v0 }
 0x1e6   : > { %v832_v28 = vsel %vm2238_vm14, 16843009, %v1920_v3 }
 0x1e7   : > { %563 = vxpose.xlu0.b32.cont [13/16] (narrow) %v501_v5, 8  ;;  %v769_v5 = vunpack.c.1.s8 %v2215_v44  ;;  %v848_v41 = vunpack.c.0.s8 %v832_v28 }
 0x1e9   : > { %v790_v16 = vpack.c.b16 %v769_v5, %v769_v5  ;;  %vm2276_vm7 = vcmp.ne.s32.totalorder %v848_v41, 0 }
 0x1eb   : > { %564 = vxpose.xlu0.b32.cont [14/16] (narrow) %v505_v9, 8  ;;  %v770_v9 = vunpack.c.2.s8 %v2215_v44  ;;  %v791_v29 = vpack.c.b8 %v790_v16, %v790_v16 }
 0x1ed   : > { %vm817_vm3 = vnez %v791_v29 }
 0x1ee   : > { %v833_v50 = vsel %vm817_vm3, 16843009, %v1920_v3 }
 0x1ef   : > { %565 = vxpose.xlu0.b32.cont [15/16] (narrow) %v511_v11, 8  ;;  %v846_v11 = vunpack.c.0.s8 %v830_v63  ;;  %v800_v63 = vpack.c.b16 %v774_v54, %v774_v54 }
 0x1f0   : > { %v605_v19 = vpop.permute.xlu0 %604 }
 0x1f1   : > { %vm2254_vm1 = vcmp.ne.s32.totalorder %v846_v11, 0 }
 0x1f3   : > { %566 = vxpose.xlu0.b32.end [16/16] (narrow) %v515_v15, 8  ;;  %v831_v15 = vsel %vm2231_vm8, 16843009, %v1920_v3  ;;  %vm759_vm8 = vnez %v755_v47 }
 0x1f4   : > { %v610_v20 = vpop.permute.xlu0 %609  ;;  %v847_v33 = vunpack.c.0.s8 %v831_v15  ;;  %v2288_v25 = vsel %vm759_vm8, 16843009, %v1920_v3 }
 0x1f5   : > { %v778_v29 = vunpack.c.2.s8 %v2288_v25  ;;  %v779_v42 = vunpack.c.3.s8 %v2288_v25 }
 0x1f6   : > { %vm863_vm4 = vcmp.ne.s32.totalorder %v847_v33, 0 }
 0x1f7   : > { %v808_v41 = vpack.c.b16 %v778_v29, %v778_v29 }
 0x1f8   : > { %v615_v24 = vpop.permute.xlu1 %614 }
 0x1fc   : > { %v2206_v30 = vpop.permute.xlu1 %619 }
 0x200   : > { %v2197_v23 = vpop.permute.xlu0 %624 }
 0x202   : > { %v2210_v37 = vpop.permute.xlu1 %629 }
 0x208   : > { %v2203_v27 = vpop.permute.xlu0 %634 }
 0x20a   : > { %v2217_v45 = vpop.permute.xlu1 %639 }
 0x210   : > { %v2208_v31 = vpop.permute.xlu0 %644 }
 0x212   : > { %v2220_v51 = vpop.permute.xlu1 %649 }
 0x218   : > { %v2212_v38 = vpop.permute.xlu0 %654 }
 0x21a   : > { %v660_v59 = vpop.permute.xlu1 %659 }
 0x220   : > { %v665_v15 = vpop.permute.xlu1 %664 }
 0x237   : > { %v567_v46 = vpop.trf.xlu0 }
 0x238   : > { %583 = vst [vmem:[#allocation5 - $0x1] sm:$0x2] %v567_v46  ;;  %v796_v46 = vpack.c.b16 %v772_v35, %v772_v35 }
 0x23a   : > { %v797_v57 = vpack.c.b8 %v796_v46, %v796_v46 }
 0x23f   : > { %v2225_v60 = vld [vmem:[#allocation5] ss:$0 sm:$0xff] }
 0x240   : > { %v699_v61 = vadd.f32 %v2225_v60, %v660_v59  ;;  %v688_v62 = vadd.f32 %v2225_v60, %v605_v19  ;;  %v689_v1 = vadd.f32 %v2225_v60, %v610_v20  ;;  %v690_v8 = vadd.f32 %v2225_v60, %v615_v24 }
 0x241   : > { %v771_v19 = vunpack.c.3.s8 %v2215_v44  ;;  %v691_v22 = vadd.f32 %v2225_v60, %v2206_v30  ;;  %v792_v24 = vpack.c.b16 %v770_v9, %v770_v9  ;;  %v692_v39 = vadd.f32 %v2225_v60, %v2197_v23 }
 0x242   : > { %vm715_vm9 = vcmp.gt.f32.partialorder %v699_v61, 0.0  ;;  %vm704_vm11 = vcmp.gt.f32.partialorder %v688_v62, 0.0  ;;  %v731_v6 = vmul.f32 0.2, %v699_v61  ;;  %v720_v7 = vmul.f32 0.2, %v688_v62 }
 0x243   : > { %vm705_vm13 = vcmp.gt.f32.partialorder %v689_v1, 0.0  ;;  %v721_v10 = vmul.f32 0.2, %v689_v1  ;;  %v722_v21 = vmul.f32 0.2, %v690_v8  ;;  %vm706_vm0 = vcmp.gt.f32.partialorder %v690_v8, 0.0 }
 0x244   : > { %v747_v13 = vsel %vm715_vm9, %v699_v61, %v731_v6  ;;  %v736_v14 = vsel %vm704_vm11, %v688_v62, %v720_v7  ;;  %v794_v34 = vpack.c.b16 %v771_v19, %v771_v19  ;;  %v723_v36 = vmul.f32 0.2, %v691_v22 }
 0x245   : > { %v2245_v17 = vsel %vm871_vm10, %v747_v13, -1e+30  ;;  %v2247_v18 = vsel %vm860_vm12, %v736_v14, -1e+30  ;;  %v737_v20 = vsel %vm705_vm13, %v689_v1, %v721_v10  ;;  %v738_v30 = vsel %vm706_vm0, %v690_v8, %v722_v21 }
 0x246   : > { %914 = vmax.xlane.f32.xlu0 %v2245_v17  ;;  %892 = vmax.xlane.f32.xlu1 %v2247_v18  ;;  %v2261_v32 = vsel %vm861_vm15, %v737_v20, -1e+30  ;;  %v793_v40 = vpack.c.b8 %v792_v24, %v792_v24  ;;  %vm707_vm2 = vcmp.gt.f32.partialorder %v691_v22, 0.0  ;;  %v2270_v43 = vsel %vm2254_vm1, %v738_v30, -1e+30 }
 0x247   : > { %v795_v44 = vpack.c.b8 %v794_v34, %v794_v34  ;;  %v739_v48 = vsel %vm707_vm2, %v691_v22, %v723_v36  ;;  %v724_v49 = vmul.f32 0.2, %v692_v39  ;;  %v693_v23 = vadd.f32 %v2225_v60, %v2210_v37 }
 0x248   : > { %vm818_vm5 = vnez %v793_v40  ;;  %vm708_vm6 = vcmp.gt.f32.partialorder %v692_v39, 0.0  ;;  %v2281_v55 = vsel %vm863_vm4, %v739_v48, -1e+30  ;;  %v849_v59 = vunpack.c.0.s8 %v833_v50 }
 0x249   : > { %v834_v56 = vsel %vm818_vm5, 16843009, %v1920_v3  ;;  %vm819_vm9 = vnez %v795_v44  ;;  %v740_v37 = vsel %vm708_vm6, %v692_v39, %v724_v49  ;;  %v725_v58 = vmul.f32 0.2, %v693_v23  ;;  %v670_v39 = vpop.permute.xlu1 %669 }
 0x24a   : > { %894 = vmax.xlane.f32.xlu1 %v2261_v32  ;;  %v694_v61 = vadd.f32 %v2225_v60, %v2203_v27  ;;  %vm709_vm10 = vcmp.gt.f32.partialorder %v693_v23, 0.0  ;;  %v799_v62 = vpack.c.b8 %v798_v53, %v798_v53  ;;  %v2292_v0 = vsel %vm2276_vm7, %v740_v37, -1e+30 }
 0x24b   : > { %v850_v1 = vunpack.c.0.s8 %v834_v56  ;;  %v835_v2 = vsel %vm819_vm9, 16843009, %v1920_v3  ;;  %vm820_vm11 = vnez %v797_v57  ;;  %v741_v4 = vsel %vm709_vm10, %v693_v23, %v725_v58 }
 0x24c   : > { %vm865_vm12 = vcmp.ne.s32.totalorder %v849_v59, 0  ;;  %v726_v5 = vmul.f32 0.2, %v694_v61  ;;  %v695_v27 = vadd.f32 %v2225_v60, %v2217_v45  ;;  %vm710_vm13 = vcmp.gt.f32.partialorder %v694_v61, 0.0 }
 0x24d   : > { %v776_v6 = vunpack.c.0.s8 %v2288_v25  ;;  %v801_v7 = vpack.c.b8 %v800_v63, %v800_v63  ;;  %v2299_v8 = vsel %vm865_vm12, %v741_v4, -1e+30  ;;  %v851_v9 = vunpack.c.0.s8 %v835_v2  ;;  %v675_v52 = vpop.permute.xlu1 %674 }
 0x24e   : > { %896 = vmax.xlane.f32.xlu1 %v2270_v43  ;;  %v836_v10 = vsel %vm820_vm11, 16843009, %v1920_v3  ;;  %vm821_vm14 = vnez %v799_v62  ;;  %v742_v11 = vsel %vm710_vm13, %v694_v61, %v726_v5  ;;  %vm866_vm15 = vcmp.ne.s32.totalorder %v850_v1, 0 }
 0x24f   : > { %v727_v12 = vmul.f32 0.2, %v695_v27  ;;  %v696_v13 = vadd.f32 %v2225_v60, %v2208_v31  ;;  %vm711_vm0 = vcmp.gt.f32.partialorder %v695_v27, 0.0  ;;  %v804_v45 = vpack.c.b16 %v776_v6, %v776_v6 }
 0x250   : > { %v777_v14 = vunpack.c.1.s8 %v2288_v25  ;;  %v2306_v16 = vsel %vm866_vm15, %v742_v11, -1e+30  ;;  %v852_v19 = vunpack.c.0.s8 %v836_v10  ;;  %v837_v20 = vsel %vm821_vm14, 16843009, %v1920_v3 }
 0x251   : > { %vm2309_vm1 = vnez %v801_v7  ;;  %v743_v22 = vsel %vm711_vm0, %v695_v27, %v727_v12  ;;  %vm867_vm2 = vcmp.ne.s32.totalorder %v851_v9, 0  ;;  %v728_v24 = vmul.f32 0.2, %v696_v13  ;;  %v680_v4 = vpop.permute.xlu1 %679 }
 0x252   : > { %898 = vmax.xlane.f32.xlu1 %v2281_v55  ;;  %v697_v31 = vadd.f32 %v2225_v60, %v2220_v51  ;;  %vm712_vm3 = vcmp.gt.f32.partialorder %v696_v13, 0.0  ;;  %v805_v26 = vpack.c.b8 %v804_v45, %v804_v45  ;;  %v806_v28 = vpack.c.b16 %v777_v14, %v777_v14 }
 0x253   : > { %v2317_v33 = vsel %vm867_vm2, %v743_v22, -1e+30  ;;  %vm868_vm4 = vcmp.ne.s32.totalorder %v852_v19, 0  ;;  %v853_v34 = vunpack.c.0.s8 %v837_v20  ;;  %v744_v35 = vsel %vm712_vm3, %v696_v13, %v728_v24 }
 0x254   : > { %v729_v30 = vmul.f32 0.2, %v697_v31  ;;  %v698_v36 = vadd.f32 %v2225_v60, %v2212_v38  ;;  %v838_v51 = vsel %vm2309_vm1, 16843009, %v1920_v3  ;;  %vm713_vm5 = vcmp.gt.f32.partialorder %v697_v31, 0.0 }
 0x255   : > { %vm824_vm6 = vnez %v805_v26  ;;  %v807_v40 = vpack.c.b8 %v806_v28, %v806_v28  ;;  %v2326_v44 = vsel %vm868_vm4, %v744_v35, -1e+30  ;;  %vm869_vm7 = vcmp.ne.s32.totalorder %v853_v34, 0 }
 0x256   : > { %900 = vmax.xlane.f32.xlu1 %v2292_v0  ;;  %v854_v46 = vunpack.c.0.s8 %v838_v51  ;;  %v745_v47 = vsel %vm713_vm5, %v697_v31, %v729_v30  ;;  %v730_v48 = vmul.f32 0.2, %v698_v36  ;;  %v700_v38 = vadd.f32 %v2225_v60, %v665_v15 }
 0x257   : > { %v840_v49 = vsel %vm824_vm6, 16843009, %v1920_v3  ;;  %vm714_vm8 = vcmp.gt.f32.partialorder %v698_v36, 0.0  ;;  %vm825_vm9 = vnez %v807_v40  ;;  %v809_v23 = vpack.c.b8 %v808_v41, %v808_v41 }
 0x258   : > { %v810_v50 = vpack.c.b16 %v779_v42, %v779_v42  ;;  %v2331_v53 = vsel %vm869_vm7, %v745_v47, -1e+30  ;;  %vm870_vm10 = vcmp.ne.s32.totalorder %v854_v46, 0  ;;  %v856_v54 = vunpack.c.0.s8 %v840_v49 }
 0x259   : > { %v746_v56 = vsel %vm714_vm8, %v698_v36, %v730_v48  ;;  %v732_v57 = vmul.f32 0.2, %v700_v38  ;;  %v701_v37 = vadd.f32 %v2225_v60, %v670_v39  ;;  %v841_v58 = vsel %vm825_vm9, 16843009, %v1920_v3 }
 0x25a   : > { %902 = vmax.xlane.f32.xlu1 %v2299_v8  ;;  %vm716_vm11 = vcmp.gt.f32.partialorder %v700_v38, 0.0  ;;  %vm826_vm12 = vnez %v809_v23  ;;  %v811_v59 = vpack.c.b8 %v810_v50, %v810_v50  ;;  %v2336_v61 = vsel %vm870_vm10, %v746_v56, -1e+30 }
 0x25b   : > { %vm872_vm13 = vcmp.ne.s32.totalorder %v856_v54, 0  ;;  %v857_v62 = vunpack.c.0.s8 %v841_v58  ;;  %v702_v63 = vadd.f32 %v2225_v60, %v675_v52  ;;  %v748_v25 = vsel %vm716_vm11, %v700_v38, %v732_v57 }
 0x25c   : > { %v733_v1 = vmul.f32 0.2, %v701_v37  ;;  %v842_v2 = vsel %vm826_vm12, 16843009, %v1920_v3  ;;  %vm717_vm14 = vcmp.gt.f32.partialorder %v701_v37, 0.0  ;;  %vm827_vm15 = vnez %v811_v59 }
 0x25d   : > { %v2341_v5 = vsel %vm872_vm13, %v748_v25, -1e+30  ;;  %v858_v27 = vunpack.c.0.s8 %v842_v2  ;;  %v734_v6 = vmul.f32 0.2, %v702_v63  ;;  %v703_v7 = vadd.f32 %v2225_v60, %v680_v4 }
 0x25e   : > { %904 = vmax.xlane.f32.xlu1 %v2306_v16  ;;  %v749_v9 = vsel %vm717_vm14, %v701_v37, %v733_v1  ;;  %vm873_vm0 = vcmp.ne.s32.totalorder %v857_v62, 0  ;;  %vm718_vm1 = vcmp.gt.f32.partialorder %v702_v63, 0.0  ;;  %v843_v10 = vsel %vm827_vm15, 16843009, %v1920_v3 }
 0x25f   : > { %v2346_v11 = vsel %vm873_vm0, %v749_v9, -1e+30  ;;  %v735_v12 = vmul.f32 0.2, %v703_v7  ;;  %v750_v13 = vsel %vm718_vm1, %v702_v63, %v734_v6  ;;  %vm874_vm2 = vcmp.ne.s32.totalorder %v858_v27, 0 }
 0x260   : > { %v859_v45 = vunpack.c.0.s8 %v843_v10  ;;  %vm719_vm3 = vcmp.gt.f32.partialorder %v703_v7, 0.0  ;;  %v2349_v14 = vsel %vm874_vm2, %v750_v13, -1e+30  ;;  %vm1922_vm6 = vmmov (!%p1444_p3), 0  }
 0x261   : > { %v751_v60 = vsel %vm719_vm3, %v703_v7, %v735_v12 }
 0x262   : > { %906 = vmax.xlane.f32.xlu1 %v2317_v33  ;;  %vm875_vm4 = vcmp.ne.s32.totalorder %v859_v45, 0 }
 0x263   : > { %v2352_v15 = vsel %vm875_vm4, %v751_v60, -1e+30 }
 0x266   : > { %908 = vmax.xlane.f32.xlu1 %v2326_v44 }
 0x26a   : > { %910 = vmax.xlane.f32.xlu1 %v2331_v53 }
 0x26e   : > { %912 = vmax.xlane.f32.xlu1 %v2336_v61 }
 0x272   : > { %916 = vmax.xlane.f32.xlu1 %v2341_v5 }
 0x276   : > { %918 = vmax.xlane.f32.xlu1 %v2346_v11 }
 0x27a   : > { %920 = vmax.xlane.f32.xlu1 %v2349_v14 }
 0x27e   : > { %922 = vmax.xlane.f32.xlu1 %v2352_v15 }
 0x2d3   : > { %v893_v3 = vpop.xlane.xlu1 %892  ;;  %v915_v52 = vpop.xlane.xlu0 %914 }
 0x2d4   : > { %v924_v19 = vsub.f32 %v2247_v18, %v893_v3 }
 0x2d6   : > { %v940_v20 = vmul.f32 1.442695, %v924_v19 }
 0x2d7   : > { %v895_v21 = vpop.xlane.xlu1 %894 }
 0x2d8   : > { %v925_v22 = vsub.f32 %v2261_v32, %v895_v21  ;;  %1682 = vpow2.f32 %v940_v20 }
 0x2da   : > { %v942_v24 = vmul.f32 1.442695, %v925_v22 }
 0x2db   : > { %v897_v31 = vpop.xlane.xlu1 %896 }
 0x2dc   : > { %1684 = vpow2.f32 %v942_v24  ;;  %v926_v26 = vsub.f32 %v2270_v43, %v897_v31 }
 0x2de   : > { %v944_v28 = vmul.f32 1.442695, %v926_v26 }
 0x2df   : > { %v899_v29 = vpop.xlane.xlu1 %898 }
 0x2e0   : > { %1686 = vpow2.f32 %v944_v28  ;;  %v927_v34 = vsub.f32 %v2281_v55, %v899_v29 }
 0x2e2   : > { %v946_v35 = vmul.f32 1.442695, %v927_v34  ;;  %v1683_v30 = vpop.eup %1682 }
 0x2e3   : > { %v901_v36 = vpop.xlane.xlu1 %900  ;;  %972 = vadd.xlane.f32.xlu1 %v1683_v30 }
 0x2e4   : > { %1688 = vpow2.f32 %v946_v35  ;;  %v928_v18 = vsub.f32 %v2292_v0, %v901_v36 }
 0x2e6   : > { %v1685_v51 = vpop.eup %1684  ;;  %v948_v32 = vmul.f32 1.442695, %v928_v18 }
 0x2e7   : > { %v903_v39 = vpop.xlane.xlu1 %902  ;;  %v1004_v40 = vpack.c.bf16 %v1685_v51, %v1683_v30  ;;  %974 = vadd.xlane.f32.xlu1 %v1685_v51 }
 0x2e8   : > { %1690 = vpow2.f32 %v948_v32  ;;  %v929_v43 = vsub.f32 %v2299_v8, %v903_v39  ;;  %v2378_v32 = vld [vmem:[%s267_s16] ss:$0 sm:$0xff] }
 0x2e9   : > { %1500 = vmatprep.mubr.bf16.mxu1 %v1004_v40 }
 0x2ea   : > { %v1687_v41 = vpop.eup %1686  ;;  %v950_v42 = vmul.f32 1.442695, %v929_v43 }
 0x2eb   : > { %v905_v46 = vpop.xlane.xlu1 %904  ;;  %976 = vadd.xlane.f32.xlu1 %v1687_v41 }
 0x2ec   : > { %1692 = vpow2.f32 %v950_v42  ;;  %v930_v55 = vsub.f32 %v2306_v16, %v905_v46  ;;  %v935_v16 = vsub.f32 %v2245_v17, %v915_v52 }
 0x2ee   : > { %v1689_v47 = vpop.eup %1688  ;;  %v952_v48 = vmul.f32 1.442695, %v930_v55  ;;  %v962_v63 = vmul.f32 1.442695, %v935_v16 }
 0x2ef   : > { %v907_v38 = vpop.xlane.xlu1 %906  ;;  %v1005_v0 = vpack.c.bf16 %v1689_v47, %v1687_v41  ;;  %978 = vadd.xlane.f32.xlu1 %v1689_v47 }
 0x2f0   : > { %1694 = vpow2.f32 %v952_v48  ;;  %v931_v49 = vsub.f32 %v2317_v33, %v907_v38  ;;  %v1190_v38 = vstv %s1189_s11 }
 0x2f1   : > { %1501 = vmatmul.mubr.bf16.vlgmr.msra.gmra.mrb[0].mxu1 %v1005_v0  ;;  %vm2383_vm5 = vcmp.eq.s32.totalorder %v1190_v38, 1 }
 0x2f2   : > { %v1691_v23 = vpop.eup %1690  ;;  %v954_v50 = vmul.f32 1.442695, %v931_v49 }
 0x2f3   : > { %v909_v8 = vpop.xlane.xlu1 %908  ;;  %980 = vadd.xlane.f32.xlu1 %v1691_v23 }
 0x2f4   : > { %1696 = vpow2.f32 %v954_v50  ;;  %v932_v54 = vsub.f32 %v2326_v44, %v909_v8 }
 0x2f6   : > { %v1693_v56 = vpop.eup %1692  ;;  %v956_v57 = vmul.f32 1.442695, %v932_v54 }
 0x2f7   : > { %v911_v37 = vpop.xlane.xlu1 %910  ;;  %v1006_v58 = vpack.c.bf16 %v1693_v56, %v1691_v23  ;;  %982 = vadd.xlane.f32.xlu1 %v1693_v56  ;;  %v1233_v56 = vld [vmem:[%s2502_s4] sm:$0xff] (!%p1444_p3) }
 0x2f8   : > { %1698 = vpow2.f32 %v956_v57  ;;  %v933_v59 = vsub.f32 %v2331_v53, %v911_v37 }
 0x2f9   : > { %1504 = vmatprep.mubr.bf16.mxu1 %v1006_v58 }
 0x2fa   : > { %v1695_v33 = vpop.eup %1694  ;;  %v958_v62 = vmul.f32 1.442695, %v933_v59 }
 0x2fb   : > { %v913_v25 = vpop.xlane.xlu1 %912  ;;  %984 = vadd.xlane.f32.xlu1 %v1695_v33 }
 0x2fc   : > { %1700 = vpow2.f32 %v958_v62  ;;  %v934_v1 = vsub.f32 %v2336_v61, %v913_v25 }
 0x2fd   : > { %1702 = vpow2.f32 %v962_v63 }
 0x2fe   : > { %v1697_v44 = vpop.eup %1696  ;;  %v960_v2 = vmul.f32 1.442695, %v934_v1 }
 0x2ff   : > { %986 = vadd.xlane.f32.xlu0 %v1697_v44  ;;  %v917_v17 = vpop.xlane.xlu1 %916  ;;  %v1007_v4 = vpack.c.bf16 %v1697_v44, %v1695_v33 }
 0x300   : > { %1704 = vpow2.f32 %v960_v2  ;;  %v936_v27 = vsub.f32 %v2341_v5, %v917_v17 }
 0x301   : > { %1505 = vmatmul.mubr.bf16.gmra.mrb[4].mxu1 %v1007_v4 }
 0x302   : > { %v1699_v53 = vpop.eup %1698  ;;  %v964_v6 = vmul.f32 1.442695, %v936_v27 }
 0x303   : > { %988 = vadd.xlane.f32.xlu1 %v1699_v53  ;;  %v919_v7 = vpop.xlane.xlu1 %918 }
 0x304   : > { %1706 = vpow2.f32 %v964_v6  ;;  %v937_v9 = vsub.f32 %v2346_v11, %v919_v7 }
 0x306   : > { %v1701_v10 = vpop.eup %1700  ;;  %v966_v12 = vmul.f32 1.442695, %v937_v9 }
 0x307   : > { %990 = vadd.xlane.f32.xlu0 %v1701_v10  ;;  %v921_v61 = vpop.xlane.xlu1 %920  ;;  %v1008_v13 = vpack.c.bf16 %v1701_v10, %v1699_v53  ;;  %v1703_v60 = vpop.eup %1702 }
 0x308   : > { %1708 = vpow2.f32 %v966_v12  ;;  %v938_v45 = vsub.f32 %v2349_v14, %v921_v61 }
 0x309   : > { %1508 = vmatprep.mubr.bf16.mxu1 %v1008_v13 }
 0x30a   : > { %v1705_v3 = vpop.eup %1704  ;;  %v968_v5 = vmul.f32 1.442695, %v938_v45 }
 0x30b   : > { %994 = vadd.xlane.f32.xlu0 %v1703_v60  ;;  %992 = vadd.xlane.f32.xlu1 %v1705_v3  ;;  %v923_v19 = vpop.xlane.xlu1 %922  ;;  %v1009_v20 = vpack.c.bf16 %v1703_v60, %v1705_v3 }
 0x30c   : > { %1710 = vpow2.f32 %v968_v5  ;;  %v939_v21 = vsub.f32 %v2352_v15, %v923_v19 }
 0x30d   : > { %1509 = vmatmul.mubr.bf16.gmra.mrb[8].mxu1 %v1009_v20 }
 0x30e   : > { %v1707_v11 = vpop.eup %1706  ;;  %v970_v22 = vmul.f32 1.442695, %v939_v21 }
 0x30f   : > { %996 = vadd.xlane.f32.xlu1 %v1707_v11 }
 0x310   : > { %1712 = vpow2.f32 %v970_v22 }
 0x312   : > { %v1709_v24 = vpop.eup %1708 }
 0x313   : > { %998 = vadd.xlane.f32.xlu0 %v1709_v24  ;;  %v1010_v31 = vpack.c.bf16 %v1709_v24, %v1707_v11 }
 0x315   : > { %1512 = vmatprep.mubr.bf16.mxu1 %v1010_v31 }
 0x316   : > { %v1711_v14 = vpop.eup %1710 }
 0x317   : > { %1000 = vadd.xlane.f32.xlu1 %v1711_v14 }
 0x31a   : > { %v1713_v26 = vpop.eup %1712 }
 0x31b   : > { %1002 = vadd.xlane.f32.xlu0 %v1713_v26  ;;  %v1011_v28 = vpack.c.bf16 %v1713_v26, %v1711_v14 }
 0x31d   : > { %1513 = vmatmul.mubr.bf16.gmra.mrb[12].mxu1 %v1011_v28 }
 0x370   : > { %v973_v29 = vpop.xlane.xlu1 %972 }
 0x374   : > { %v975_v34 = vpop.xlane.xlu1 %974 }
 0x378   : > { %v977_v15 = vpop.xlane.xlu1 %976 }
 0x379   : > { %1714 = vrcp.f32 %v977_v15 }
 0x37a   : > { %1716 = vrcp.f32 %v973_v29 }
 0x37c   : > { %v979_v35 = vpop.xlane.xlu1 %978 }
 0x37d   : > { %1718 = vrcp.f32 %v979_v35 }
 0x37e   : > { %1720 = vrcp.f32 %v975_v34 }
 0x380   : > { %v981_v30 = vpop.xlane.xlu1 %980 }
 0x383   : > { %v1715_v18 = vpop.eup %1714 }
 0x384   : > { %v983_v36 = vpop.xlane.xlu1 %982  ;;  %v1717_v39 = vpop.eup %1716 }
 0x387   : > { %v1719_v41 = vpop.eup %1718 }
 0x388   : > { %v1721_v55 = vpop.eup %1720  ;;  %v985_v47 = vpop.xlane.xlu1 %984 }
 0x389   : > { %1722 = vrcp.f32 %v985_v47 }
 0x38a   : > { %1724 = vrcp.f32 %v981_v30 }
 0x38c   : > { %v987_v8 = vpop.xlane.xlu0 %986 }
 0x38d   : > { %1726 = vrcp.f32 %v987_v8 }
 0x38e   : > { %1728 = vrcp.f32 %v983_v36 }
 0x390   : > { %v989_v1 = vpop.xlane.xlu1 %988 }
 0x393   : > { %v1723_v4 = vpop.eup %1722 }
 0x394   : > { %v991_v44 = vpop.xlane.xlu0 %990  ;;  %v1725_v53 = vpop.eup %1724 }
 0x397   : > { %v1727_v10 = vpop.eup %1726 }
 0x398   : > { %v993_v17 = vpop.xlane.xlu1 %992  ;;  %v995_v6 = vpop.xlane.xlu0 %994 }
 0x399   : > { %1730 = vrcp.f32 %v993_v17  ;;  %v1729_v13 = vpop.eup %1728 }
 0x39a   : > { %1732 = vrcp.f32 %v989_v1 }
 0x39b   : > { %1734 = vrcp.f32 %v995_v6 }
 0x39c   : > { %1736 = vrcp.f32 %v991_v44  ;;  %v997_v15 = vpop.xlane.xlu1 %996 }
 0x3a3   : > { %v1731_v30 = vpop.eup %1730 }
 0x3c4   : > { %v1502_v51 = vpop.f32.mrb[0].mxu1 }
 0x3c5   : > { %v1135_v40 = vmul.f32 %v1715_v18, %v1502_v51  ;;  %v1054_v43 = vpop.f32.mrb[1].mxu1  ;;  %v1733_v18 = vpop.eup %1732 }
 0x3c6   : > { %v1133_v42 = vmul.f32 %v1717_v39, %v1054_v43  ;;  %v1503_v46 = vpop.f32.mrb[2].mxu1  ;;  %v999_v51 = vpop.xlane.xlu0 %998 }
 0x3c7   : > { %v1158_v48 = vadd.f32 %v2378_v32, %v1135_v40  ;;  %v1136_v0 = vmul.f32 %v1719_v41, %v1503_v46  ;;  %v1057_v49 = vpop.f32.mrb[3].mxu1  ;;  %v1735_v43 = vpop.eup %1734 }
 0x3c8   : > { %v1156_v23 = vadd.f32 %v2378_v32, %v1133_v42  ;;  %v1134_v50 = vmul.f32 %v1721_v55, %v1057_v49  ;;  %v1737_v46 = vpop.eup %1736  ;;  %v1001_v55 = vpop.xlane.xlu1 %1000 }
 0x3c9   : > { %v1175_v52 = vmax.f32 %v1158_v48, 0.0  ;;  %v1159_v54 = vadd.f32 %v2378_v32, %v1136_v0  ;;  %1738 = vrcp.f32 %v1001_v55 }
 0x3ca   : > { %v1173_v57 = vmax.f32 %v1156_v23, 0.0  ;;  %v1157_v16 = vadd.f32 %v2378_v32, %v1134_v50  ;;  %1740 = vrcp.f32 %v997_v15 }
 0x3cb   : > { %v1176_v37 = vmax.f32 %v1159_v54, 0.0  ;;  %v1194_v59 = vsel %vm2383_vm5, %v1175_v52, %v1158_v48 }
 0x3cc   : > { %v1174_v58 = vmax.f32 %v1157_v16, 0.0  ;;  %v1192_v62 = vsel %vm2383_vm5, %v1173_v57, %v1156_v23  ;;  %v1003_v23 = vpop.xlane.xlu0 %1002 }
 0x3cd   : > { %v1195_v33 = vsel %vm2383_vm5, %v1176_v37, %v1159_v54  ;;  %1742 = vrcp.f32 %v1003_v23 }
 0x3ce   : > { %v2394_v63 = vpack.c.bf16 %v1195_v33, %v1194_v59  ;;  %v1193_v25 = vsel %vm2383_vm5, %v1174_v58, %v1157_v16  ;;  %1744 = vrcp.f32 %v999_v51 }
 0x3cf   : > { %v2398_v2 = vpack.c.bf16 %v1193_v25, %v1192_v62 }
 0x3d0   : > { %1221 = vst [vmem:[#allocation2 + $0x8] sm:$0xff] %v2394_v63 }
 0x3d1   : > { %1220 = vst [vmem:[#allocation2] sm:$0xff] %v2398_v2 }
 0x3d3   : > { %v1739_v1 = vpop.eup %1738 }
 0x3d4   : > { %v1506_v27 = vpop.f32.mrb[4].mxu1  ;;  %v1741_v17 = vpop.eup %1740 }
 0x3d5   : > { %v1139_v7 = vmul.f32 %v1723_v4, %v1506_v27  ;;  %v1070_v9 = vpop.f32.mrb[5].mxu1 }
 0x3d6   : > { %v1137_v12 = vmul.f32 %v1725_v53, %v1070_v9  ;;  %v1507_v61 = vpop.f32.mrb[6].mxu1 }
 0x3d7   : > { %v1162_v45 = vadd.f32 %v2378_v32, %v1139_v7  ;;  %v1140_v60 = vmul.f32 %v1727_v10, %v1507_v61  ;;  %v1073_v3 = vpop.f32.mrb[7].mxu1  ;;  %v1743_v53 = vpop.eup %1742 }
 0x3d8   : > { %v1160_v5 = vadd.f32 %v2378_v32, %v1137_v12  ;;  %v1138_v19 = vmul.f32 %v1729_v13, %v1073_v3  ;;  %v1745_v9 = vpop.eup %1744 }
 0x3d9   : > { %v1179_v20 = vmax.f32 %v1162_v45, 0.0  ;;  %v1163_v21 = vadd.f32 %v2378_v32, %v1140_v60 }
 0x3da   : > { %v1177_v11 = vmax.f32 %v1160_v5, 0.0  ;;  %v1161_v22 = vadd.f32 %v2378_v32, %v1138_v19 }
 0x3db   : > { %v1180_v24 = vmax.f32 %v1163_v21, 0.0  ;;  %v1198_v14 = vsel %vm2383_vm5, %v1179_v20, %v1162_v45 }
 0x3dc   : > { %v1178_v31 = vmax.f32 %v1161_v22, 0.0  ;;  %v1196_v28 = vsel %vm2383_vm5, %v1177_v11, %v1160_v5 }
 0x3dd   : > { %v1199_v26 = vsel %vm2383_vm5, %v1180_v24, %v1163_v21 }
 0x3de   : > { %v2412_v29 = vpack.c.bf16 %v1199_v26, %v1198_v14  ;;  %v1197_v34 = vsel %vm2383_vm5, %v1178_v31, %v1161_v22 }
 0x3df   : > { %v2416_v35 = vpack.c.bf16 %v1197_v34, %v1196_v28  ;;  %v1923_v28 = vmov (!%p1444_p3), 0.0  }
 0x3e0   : > { %1223 = vst [vmem:[#allocation2 + $0x18] sm:$0xff] %v2412_v29  ;;  %v1510_v36 = vpop.f32.mrb[8].mxu1  ;;  %1548 = vmatprep.mubr.msk.f32.mxu0 (!%p1444_p3), %vm1922_vm6, %v1923_v28 }
 0x3e1   : > { %1222 = vst [vmem:[#allocation2 + $0x10] sm:$0xff] %v2416_v35  ;;  %v1143_v39 = vmul.f32 %v1731_v30, %v1510_v36  ;;  %v1086_v40 = vpop.f32.mrb[9].mxu1 }
 0x3e2   : > { %v1141_v41 = vmul.f32 %v1733_v18, %v1086_v40  ;;  %v1511_v42 = vpop.f32.mrb[10].mxu1 }
 0x3e3   : > { %v1166_v47 = vadd.f32 %v2378_v32, %v1143_v39  ;;  %v1144_v48 = vmul.f32 %v1735_v43, %v1511_v42  ;;  %v1089_v38 = vpop.f32.mrb[11].mxu1 }
 0x3e4   : > { %v1164_v0 = vadd.f32 %v2378_v32, %v1141_v41  ;;  %v1142_v49 = vmul.f32 %v1737_v46, %v1089_v38 }
 0x3e5   : > { %v1183_v50 = vmax.f32 %v1166_v47, 0.0  ;;  %v1167_v8 = vadd.f32 %v2378_v32, %v1144_v48 }
 0x3e6   : > { %v1181_v52 = vmax.f32 %v1164_v0, 0.0  ;;  %v1165_v54 = vadd.f32 %v2378_v32, %v1142_v49 }
 0x3e7   : > { %v1184_v57 = vmax.f32 %v1167_v8, 0.0  ;;  %v1202_v37 = vsel %vm2383_vm5, %v1183_v50, %v1166_v47 }
 0x3e8   : > { %v1182_v16 = vmax.f32 %v1165_v54, 0.0  ;;  %v1200_v59 = vsel %vm2383_vm5, %v1181_v52, %v1164_v0 }
 0x3e9   : > { %v1203_v58 = vsel %vm2383_vm5, %v1184_v57, %v1167_v8 }
 0x3ea   : > { %v1213_v33 = vpack.c.bf16 %v1203_v58, %v1202_v37  ;;  %v1201_v62 = vsel %vm2383_vm5, %v1182_v16, %v1165_v54 }
 0x3eb   : > { %v1212_v25 = vpack.c.bf16 %v1201_v62, %v1200_v59 }
 0x3ec   : > { %1225 = vst [vmem:[#allocation2 + $0x28] sm:$0xff] %v1213_v33 }
 0x3ed   : > { %1224 = vst [vmem:[#allocation2 + $0x20] sm:$0xff] %v1212_v25 }
 0x3f0   : > { %v1514_v44 = vpop.f32.mrb[12].mxu1 }
 0x3f1   : > { %v1147_v4 = vmul.f32 %v1739_v1, %v1514_v44  ;;  %v1102_v27 = vpop.f32.mrb[13].mxu1 }
 0x3f2   : > { %v1145_v6 = vmul.f32 %v1741_v17, %v1102_v27  ;;  %v1515_v7 = vpop.f32.mrb[14].mxu1 }
 0x3f3   : > { %v1170_v10 = vadd.f32 %v2378_v32, %v1147_v4  ;;  %v1148_v12 = vmul.f32 %v1743_v53, %v1515_v7  ;;  %v1105_v61 = vpop.f32.mrb[15].mxu1 }
 0x3f4   : > { %v1168_v13 = vadd.f32 %v2378_v32, %v1145_v6  ;;  %v1146_v45 = vmul.f32 %v1745_v9, %v1105_v61 }
 0x3f5   : > { %v1187_v60 = vmax.f32 %v1170_v10, 0.0  ;;  %v1171_v3 = vadd.f32 %v2378_v32, %v1148_v12 }
 0x3f6   : > { %v1185_v5 = vmax.f32 %v1168_v13, 0.0  ;;  %v1169_v19 = vadd.f32 %v2378_v32, %v1146_v45  ;;  %v1921_v32 = vmov (!%p1444_p3), 0.0|0.0  }
 0x3f7   : > { %v1188_v20 = vmax.f32 %v1171_v3, 0.0  ;;  %v1206_v11 = vsel %vm2383_vm5, %v1187_v60, %v1170_v10  ;;  %1231 = sbr.rel (%p1444_p3) target bundleno = 1262 (0x4ee), region = 61  ;;  %1551 = vmatprep.subr.bf16.mxu0 (!%p1444_p3), %v1921_v32 }
 0x3f8   : > { %v1186_v21 = vmax.f32 %v1169_v19, 0.0  ;;  %v1204_v24 = vsel %vm2383_vm5, %v1185_v5, %v1168_v13  ;;  %1553 = vmatpush3.bf16.msra.mxu0 (!%p1444_p3), %v2398_v2 }
 0x3f9   : > { %v1207_v22 = vsel %vm2383_vm5, %v1188_v20, %v1171_v3  ;;  %1554 = vmatprep.subr.bf16.mxu0 (!%p1444_p3), %v1921_v32 }
 0x3fa   : > { %v1215_v31 = vpack.c.bf16 %v1207_v22, %v1206_v11  ;;  %v1205_v14 = vsel %vm2383_vm5, %v1186_v21, %v1169_v19 }
 0x3fb   : > { %v1214_v26 = vpack.c.bf16 %v1205_v14, %v1204_v24 }
 0x3fc   : > { %1227 = vst [vmem:[#allocation2 + $0x38] sm:$0xff] %v1215_v31  ;;  %1556 = vmatpush3.bf16.msra.mxu0 (!%p1444_p3), %v2394_v63  ;;  %v1232_v63 = vld [vmem:[#allocation11] sm:$0xff] (!%p1444_p3) }
 0x3fd   : > { %1226 = vst [vmem:[#allocation2 + $0x30] sm:$0xff] %v1214_v26  ;;  %1557 = vmatprep.subr.bf16.mxu0 (!%p1444_p3), %v1921_v32 }
 0x400   : > { %1559 = vmatpush3.bf16.msra.mxu0 %v2416_v35 }
 0x401   : > { %1560 = vmatprep.subr.bf16.mxu0 %v1921_v32 }
 0x404   : > { %1562 = vmatpush3.bf16.msra.mxu0 %v2412_v29 }
 0x405   : > { %1563 = vmatprep.subr.bf16.mxu0 %v1921_v32 }
 0x408   : > { %1565 = vmatpush3.bf16.msra.mxu0 %v1212_v25 }
 0x409   : > { %1566 = vmatprep.subr.bf16.mxu0 %v1921_v32 }
 0x40c   : > { %1568 = vmatpush3.bf16.msra.mxu0 %v1213_v33 }
 0x40d   : > { %1569 = vmatprep.subr.bf16.mxu0 %v1921_v32 }
 0x410   : > { %1571 = vmatpush3.bf16.msra.mxu0 %v1214_v26 }
 0x411   : > { %1572 = vmatprep.subr.bf16.mxu0 %v1921_v32 }
 0x414   : > { %1574 = vmatpush3.bf16.msra.mxu0 %v1215_v31 }
 0x417   : > { %1549 = vmatmul.mubr.f32.vlgmr.msra.gmra.mrb[0].mxu0 %v1233_v56 }
 0x4ea   : > { %v1300_v2 = vpop.f32.mrb[0].mxu0 }
 0x4eb   : > { %v1304_v34 = vadd.f32 %v1300_v2, %v1232_v63  ;;  %v1550_v15 = vpop.f32.mrb[1].mxu0 }
 0x4ed   : > { %1305 = vst [vmem:[#allocation11] sm:$0xff] %v1304_v34 }
 0x4ee PF: > { %p2454_p12 = scmp.eq.s32.totalorder %s1414_s24, 2  ;;  %s1924_s29 = smov [#allocation11]  }
 0x4ef   : > { %s1313_s14 = sshll.u32 %s1924_s29, 4  ;;  %s1314_s14 = int_to_ptr.vmem [resolvable:$true] %s1313_s14 }
 0x4f0   : > { %s1826_s26 = scalar_lea.vmem %s1314_s14, 128  ;;  %p1833_p1 = scmp.lt.s32.totalorder %s1314_s14, %s1314_s14 }
 0x4f1   : > { %p1827_p0 = scmp.ne.s32.totalorder %s1314_s14, %s1826_s26  ;;  %p1834_p4 = scmp.lt.s32.totalorder %s1826_s26, %s1826_s26 }
 0x4f3   : > { %p1828_p6 = pnand %p1827_p0, %p2454_p12  ;;  %p1835_p5 = por %p1834_p4, %p1833_p1 }
 0x4f5   : > { %p1829_p7 = pneg %p1828_p6 }
 0x4f7   : > { %p1836_p8 = pnand %p1835_p5, %p1829_p7 }
 0x4f9   : > { %1839 = shalt.err (!%p1836_p8)
}
 0x4fa   : > { %s1840_s24 = scalar_lea.hbm %s2503_s5, 128 }
 0x4fb   : > { %p1841_p9 = scmp.ne.s32.totalorder %s2503_s5, %s1840_s24  ;;  %p1846_p13 = scmp.lt.u32.totalorder %s1840_s24, %s2503_s5 }
 0x4fd   : > { %p1842_p10 = pnand %p1841_p9, %p2454_p12 }
 0x4ff   : > { %p1843_p11 = pneg %p1842_p10 }
 0x501   : > { %p1848_p2 = pnand %p1846_p13, %p1843_p11 }
 0x503   : > { %1851 = shalt.err (!%p1848_p2)
}
 0x504   : > { %1582 = dma.vmem_to_hbm [thread:$0]  (%p2454_p12), %s1314_s14, 128, %s2503_s5, [#allocation8]  }
 0x505   : > { %1887 = dma.done.wait (%p2454_p12), [#allocation8], 128  }
 0x506   : > { %1889 = vsyncadd (%p2454_p12), [#allocation8], 4294967168 }
 0x507 PF: > { %s20_s23 = sadd.s32 1, %s1912_s23   ;;  %s2529_s18 = smov %s1896_s19 }
 0x508   : > { %p17_p3 = scmp.ge.s32.totalorder %s20_s23, 5   ;;  %s2530_s19 = smov %s1900_s20 }
 0x509   : > { %s2531_s20 = smov %s2043_s10  ;;  %s2532_s21 = smov %s1908_s22 }
 0x50a   : > { %s2533_s22 = smov %s2535_s6  ;;  %19 = sbr.rel (!%p17_p3) target bundleno = 6 (0x6), region = 104 }
 0x511   :  { %1326 = vsyncpa [#allocation7], 1 }
 0x512   :  { %1328 = vsyncpa [#allocation7 + $0x1], 1 }
 0x513   :  { %1329 = vsyncpa [#allocation10], 1 }
 0x514   :  { %1331 = vsyncpa [#allocation10 + $0x1], 1 }
 0x515   :  { %1332 = vsyncpa [#allocation8], 1 }
 0x516   :  { %1334 = vsyncpa [#allocation8 + $0x1], 1 }

</bundles_post_ra>
